<compile_context>
chip_gen: v7x
topology: tpu7x:2x2x1
jax: 0.10.0
libtpu: 0.0.40
codegen_flags: <defaults>
</compile_context>

<pallas_src>
import jax
import jax.numpy as jnp
from jax.experimental import pallas as pl
from jax.experimental.pallas import tpu as pltpu


# ---------------------------------------------------------------------------
# Fused kernel: gt-mask / net_sound / net_synthesizer / weighted-BCE loss.
# grid = (num_pixel_tiles, N); block layout (B, S_tile, LW): sublanes = S_tile,
# lanes = LW, B is a leading (non-vreg) dim.
# ---------------------------------------------------------------------------
def _make_kernel(N, B, S_tile, LW, K, FT, needs_mask):
    def kernel(mag_ref, mags_ref, ff_ref, ws_ref, bs_ref, sb_ref,
               err_ref, pred_ref, gt_ref, w_ref,
               fs_scr, w_scr, half_scr, loss_scr):
        n = pl.program_id(1)

        # ---- mag_mix-only work: once per pixel tile (n == 0) -----------------
        @pl.when(n == 0)
        def _():
            mm = mag_ref[...] + 1e-10                              # (B, S_tile, LW)
            half_scr[...] = 0.5 * mm                               # gt threshold, reused
            weight = jnp.clip(jnp.log(1.0 + mm), 0.001, 10.0)      # weighted_loss
            if needs_mask:
                # zero the loss weight on padded pixel columns
                p = pl.program_id(0)
                s_idx = jax.lax.broadcasted_iota(jnp.int32, (S_tile, LW), 0)
                l_idx = jax.lax.broadcasted_iota(jnp.int32, (S_tile, LW), 1)
                flat = (p * S_tile + s_idx) * LW + l_idx
                weight = weight * (flat < FT).astype(jnp.float32)[None, :, :]
            w_scr[...] = weight
            w_ref[...] = weight                                    # write once
            log_mm = jnp.log(mm)                                   # log_mag_mix
            # net_sound: 1x1 conv (1 -> K) + sigmoid, stored (K, B, S_tile, LW)
            for k in range(K):
                fs_scr[k] = jax.nn.sigmoid(ws_ref[k] * log_mm + bs_ref[k])
            loss_scr[...] = jnp.zeros_like(loss_scr)

        # ---- per-source work --------------------------------------------------
        sb = sb_ref[0]
        for b in range(B):                                         # B is leading dim
            gt_b = (mags_ref[0, b] > half_scr[b]).astype(jnp.float32)

            # net_synthesizer: K-contraction as unrolled VPU multiply-adds
            # (K=8 on the MXU would be almost all padding).
            base = (n * B + b) * K
            acc = ff_ref[base] * fs_scr[0, b]
            for k in range(1, K):
                acc = acc + ff_ref[base + k] * fs_scr[k, b]
            logits = acc + sb

            # fused output-sigmoid + weighted BCE (logits form, stable):
            # one exp + one log per element; sigmoid via approx reciprocal.
            e = jnp.exp(-jnp.abs(logits))
            r = pl.reciprocal(1.0 + e, approx=True)
            pred_b = jnp.where(logits >= 0.0, r, 1.0 - r)          # output_activation
            bce_b = jnp.maximum(logits, 0.0) - gt_b * logits + jnp.log(1.0 + e)

            pred_ref[0, b] = pred_b.astype(pred_ref.dtype)
            gt_ref[0, b] = gt_b.astype(gt_ref.dtype)
            loss_scr[...] += w_scr[b] * bce_b                      # elementwise partial

        # single cross-lane reduce + scalar store only at the last source
        @pl.when(n == N - 1)
        def _():
            err_ref[...] = jnp.broadcast_to(jnp.sum(loss_scr[...]), (1, 1, 1))

    return kernel


# ---------------------------------------------------------------------------
# Layout / tile picker: lane width, padded sublane rows, sublane tile size.
# ---------------------------------------------------------------------------
def _pick_layout(FT, B, K):
    try:
        info = pltpu.get_tpu_info()
        cap = int(getattr(info, "vmem_capacity_bytes", 64 * 1024 * 1024))
    except Exception:
        cap = 64 * 1024 * 1024                     # conservative: v7x per-TC VMEM
    budget = max(4 * 1024 * 1024, int(cap * 0.35))

    SUB = 16                                       # bf16-friendly sublane granule
    # Lane width: 512 already saturates the HBM roofline; go smaller only when
    # the problem is tiny so the "parallel" pixel axis still gets >= 2 tiles.
    LW = 128
    for cand in (512, 256):
        if FT >= 2 * SUB * cand:
            LW = cand
            break

    S = pl.cdiv(FT, LW)
    S_pad = pl.cdiv(S, SUB) * SUB

    # f32-equivalent bytes per pixel in flight:
    #   double-buffered streams per b: mag + mags + weight (f32) + pred + gt (bf16)
    #   persistent scratch per b: fs (K rows) + weight + half;  + loss (per pixel)
    bytes_per_px = 4 * (B * (2 * (3 + 1) + K + 2) + 1)
    max_rows = max(SUB, (budget // bytes_per_px) // LW // SUB * SUB)

    divisors = [d for d in range(SUB, S_pad + 1, SUB) if S_pad % d == 0]
    fitting = [d for d in divisors if d <= max_rows] or [SUB]
    # prefer >= 2 pixel tiles so the parallel axis shards across v7x's 2 TCs
    multi = [d for d in fitting if S_pad // d >= 2]
    S_tile = max(multi) if multi else max(fitting)
    num_p = S_pad // S_tile

    vmem_limit = int(min(int(cap * 0.7), 96 * 1024 * 1024))
    return LW, S_pad, S_tile, num_p, vmem_limit


def netwrapper_forward(mag_mix, mags, frames, params, num_mix):
    """mag_mix: (B,1,F,T)  mags: (N,B,1,F,T)  frames: (N,B,C,H,W)."""
    # TODO(synk): args.log_freq path (warpgrid + F.grid_sample) has no clean
    # Pallas equivalent (irregular bilinear gather); log_freq=False here.
    N = num_mix
    B, _, F, T = mag_mix.shape
    C = frames.shape[2]
    K = params["w_sound"].shape[0]
    FT = F * T

    # --- net_frame (GAP + linear + sigmoid): tiny, plain jnp (XLA fuses it). ---
    pooled = jnp.mean(frames.reshape(N * B, C, -1).astype(jnp.float32), axis=-1)
    ff = jax.nn.sigmoid(pooled @ params["w_frame"] + params["b_frame"])
    ff = ff.reshape(N * B * K).astype(jnp.float32)                 # flat, SMEM friendly

    # --- sublane+lane dense spectrogram layout: (B, S_pad, LW). ----------------
    LW, S_pad, S_tile, num_p, vmem_limit = _pick_layout(FT, B, K)
    FT_pad = S_pad * LW
    needs_mask = FT_pad != FT

    mag_flat = mag_mix[:, 0].astype(jnp.float32).reshape(B, FT)
    mags_flat = mags[:, :, 0].astype(jnp.float32).reshape(N, B, FT)
    if needs_mask:
        pad = FT_pad - FT
        mag_flat = jnp.pad(mag_flat, ((0, 0), (0, pad)))
        mags_flat = jnp.pad(mags_flat, ((0, 0), (0, 0), (0, pad)))
    mag3 = mag_flat.reshape(B, S_pad, LW)
    mags3 = mags_flat.reshape(N, B, S_pad, LW)

    ws = params["w_sound"].astype(jnp.float32).reshape(K)
    bs = params["b_sound"].astype(jnp.float32).reshape(K)
    sb = params["synth_bias"].astype(jnp.float32).reshape(1)

    kernel = _make_kernel(N, B, S_tile, LW, K, FT, needs_mask)

    err_t, pred, gt, weight = pl.pallas_call(
        kernel,
        grid=(num_p, N),
        in_specs=[
            pl.BlockSpec((B, S_tile, LW), lambda p, n: (0, p, 0)),        # mag_mix
            pl.BlockSpec((1, B, S_tile, LW), lambda p, n: (n, 0, p, 0)),  # mags[n]
            pl.BlockSpec(memory_space=pltpu.MemorySpace.SMEM),            # feat_frames
            pl.BlockSpec(memory_space=pltpu.MemorySpace.SMEM),            # w_sound
            pl.BlockSpec(memory_space=pltpu.MemorySpace.SMEM),            # b_sound
            pl.BlockSpec(memory_space=pltpu.MemorySpace.SMEM),            # synth_bias
        ],
        out_specs=[
            pl.BlockSpec((1, 1, 1), lambda p, n: (p, 0, 0)),              # per-tile loss
            pl.BlockSpec((1, B, S_tile, LW), lambda p, n: (n, 0, p, 0)),  # pred_masks
            pl.BlockSpec((1, B, S_tile, LW), lambda p, n: (n, 0, p, 0)),  # gt_masks
            pl.BlockSpec((B, S_tile, LW), lambda p, n: (0, p, 0)),        # weight
        ],
        out_shape=[
            jax.ShapeDtypeStruct((num_p, 1, 1), jnp.float32),
            jax.ShapeDtypeStruct((N, B, S_pad, LW), jnp.bfloat16),
            jax.ShapeDtypeStruct((N, B, S_pad, LW), jnp.bfloat16),
            jax.ShapeDtypeStruct((B, S_pad, LW), jnp.float32),
        ],
        scratch_shapes=[
            pltpu.VMEM((K, B, S_tile, LW), jnp.float32),                  # feat_sound
            pltpu.VMEM((B, S_tile, LW), jnp.float32),                     # weight
            pltpu.VMEM((B, S_tile, LW), jnp.float32),                     # 0.5*mag_mix
            pltpu.VMEM((S_tile, LW), jnp.float32),                        # loss partials
        ],
        compiler_params=pltpu.CompilerParams(
            dimension_semantics=("parallel", "arbitrary"),
            vmem_limit_bytes=vmem_limit),
    )(mag3, mags3, ff, ws, bs, sb)

    # Unpad / reshape back to (B, 1, F, T).
    pred = pred.reshape(N, B, FT_pad)[:, :, :FT].reshape(N, B, 1, F, T)
    gt = gt.reshape(N, B, FT_pad)[:, :, :FT].reshape(N, B, 1, F, T)
    weight = weight.reshape(B, FT_pad)[:, :FT].reshape(B, 1, F, T)

    err = (jnp.sum(err_t) / float(N * B * FT)).reshape(1)
    outputs = {
        # pred/gt kept in the kernel's bf16 output dtype (gt exact; pred within tol)
        "pred_masks": [pred[n] for n in range(N)],
        "gt_masks": [gt[n] for n in range(N)],
        "mag_mix": mag_mix.astype(jnp.float32) + 1e-10,
        "mags": [mags[n].astype(jnp.float32) for n in range(N)],
        "weight": weight,
    }
    return err, outputs


# ---------------------------------------------------------------------------
# Pure-JAX reference (same synthetic sub-nets) for a correctness check.
# ---------------------------------------------------------------------------
def reference_forward(mag_mix, mags, frames, params, num_mix):
    N = num_mix
    B = mag_mix.shape[0]
    C = frames.shape[2]
    K = params["w_sound"].shape[0]
    mm = mag_mix[:, 0].astype(jnp.float32) + 1e-10                  # (B, F, T)
    weight = jnp.clip(jnp.log(1.0 + mm), 0.001, 10.0)
    log_mm = jnp.log(mm)
    pooled = jnp.mean(frames.reshape(N * B, C, -1).astype(jnp.float32), axis=-1)
    ff = jax.nn.sigmoid(pooled @ params["w_frame"] + params["b_frame"])
    ff = ff.reshape(N, B, K)
    feat_sound = jax.nn.sigmoid(
        params["w_sound"][None, :, None, None] * log_mm[:, None]
        + params["b_sound"][None, :, None, None])                   # (B, K, F, T)
    errs, preds, gts = [], [], []
    for n in range(N):
        gt = (mags[n, :, 0].astype(jnp.float32) > 0.5 * mm).astype(jnp.float32)
        logits = (jnp.sum(ff[n][:, :, None, None] * feat_sound, axis=1)
                  + params["synth_bias"][0])
        pred = jax.nn.sigmoid(logits)
        bce = (jnp.maximum(logits, 0.0) - gt * logits
               + jnp.log(1.0 + jnp.exp(-jnp.abs(logits))))
        errs.append(jnp.mean(weight * bce))
        preds.append(pred)
        gts.append(gt)
    return jnp.mean(jnp.stack(errs)), preds, gts, weight


if __name__ == "__main__":
    # Small shapes consistent with the forward pass.
    N, B, Freq, T = 2, 2, 64, 64        # num_mix, batch, freq bins, time frames
    C, H, W = 3, 8, 8                   # frame image channels / spatial
    K = 8                               # feature channels

    key = jax.random.PRNGKey(0)
    k1, k2, k3, k4, k5, k6 = jax.random.split(key, 6)

    params = {
        "w_frame": 0.5 * jax.random.normal(k1, (C, K), jnp.float32),
        "b_frame": 0.1 * jax.random.normal(k2, (1, K), jnp.float32),
        "w_sound": 0.5 * jax.random.normal(k3, (K,), jnp.float32),
        "b_sound": 0.1 * jax.random.normal(k4, (K,), jnp.float32),
        "synth_bias": jnp.zeros((1,), jnp.float32),
    }

    # batch_data
    mags = jax.random.uniform(k5, (N, B, 1, Freq, T), jnp.float32, 0.0, 2.0)
    mag_mix = jnp.sum(mags, axis=0)                                 # (B, 1, F, T)
    frames = jax.random.uniform(k6, (N, B, C, H, W), jnp.float32, -1.0, 1.0)

    err, outs = netwrapper_forward(mag_mix, mags, frames, params, num_mix=N)
    jax.block_until_ready(err)
    for p in outs["pred_masks"]:
        jax.block_until_ready(p)

    # Check against the pure-JAX reference (tolerance covers bf16 outputs and
    # the approx-reciprocal sigmoid in the kernel).
    err_ref, preds_ref, gts_ref, weight_ref = reference_forward(
        mag_mix, mags, frames, params, num_mix=N)
    assert jnp.allclose(err[0], err_ref, rtol=1e-3, atol=1e-4), (err, err_ref)
    for n in range(N):
        assert jnp.allclose(outs["pred_masks"][n][:, 0].astype(jnp.float32),
                            preds_ref[n], rtol=1e-2, atol=1e-2)
        assert jnp.allclose(outs["gt_masks"][n][:, 0].astype(jnp.float32),
                            gts_ref[n])
    assert jnp.allclose(outs["weight"][:, 0], weight_ref, rtol=1e-5, atol=1e-5)

    print("KERNEL_OK")
</pallas_src>

<mosaic_0001>
module attributes {stable_mosaic.version = 11 : i64} {
  func.func @kernel(%arg0: i32, %arg1: i32, %arg2: memref<2x16x128xf32, #tpu.memory_space<vmem>>, %arg3: memref<1x2x16x128xf32, #tpu.memory_space<vmem>>, %arg4: memref<32xf32, #tpu.memory_space<smem>>, %arg5: memref<8xf32, #tpu.memory_space<smem>>, %arg6: memref<8xf32, #tpu.memory_space<smem>>, %arg7: memref<1xf32, #tpu.memory_space<smem>>, %arg8: memref<1x1x1xf32, #tpu.memory_space<vmem>>, %arg9: memref<1x2x16x128xbf16, #tpu.memory_space<vmem>>, %arg10: memref<1x2x16x128xbf16, #tpu.memory_space<vmem>>, %arg11: memref<2x16x128xf32, #tpu.memory_space<vmem>>, %arg12: memref<8x2x16x128xf32, #tpu.memory_space<vmem>>, %arg13: memref<2x16x128xf32, #tpu.memory_space<vmem>>, %arg14: memref<2x16x128xf32, #tpu.memory_space<vmem>>, %arg15: memref<16x128xf32, #tpu.memory_space<vmem>>) attributes {dimension_semantics = [#tpu.dimension_semantics<parallel>, #tpu.dimension_semantics<arbitrary>], iteration_bounds = array<i64: 2, 2>, scalar_prefetch = 0 : i64, scratch_operands = 4 : i64, tpu.core_type = #tpu.core_type<tc>, window_params = [{transform_indices = @transform_0, window_bounds = array<i64: 2, 16, 128>}, {transform_indices = @transform_1, window_bounds = array<i64: 1, 2, 16, 128>}, {transform_indices = @transform_2, window_bounds = array<i64: 32>}, {transform_indices = @transform_3, window_bounds = array<i64: 8>}, {transform_indices = @transform_4, window_bounds = array<i64: 8>}, {transform_indices = @transform_5, window_bounds = array<i64: 1>}, {transform_indices = @transform_6, window_bounds = array<i64: 1, 1, 1>}, {transform_indices = @transform_7, window_bounds = array<i64: 1, 2, 16, 128>}, {transform_indices = @transform_8, window_bounds = array<i64: 1, 2, 16, 128>}, {transform_indices = @transform_9, window_bounds = array<i64: 2, 16, 128>}]} {
    %c0_i32 = arith.constant 0 : i32
    %0 = arith.cmpi eq, %arg1, %c0_i32 : i32
    %1 = arith.extui %0 : i1 to i32
    %c0_i32_0 = arith.constant 0 : i32
    %2 = arith.cmpi ne, %1, %c0_i32_0 : i32
    scf.if %2 {
      %c0_127 = arith.constant 0 : index
      %c0_128 = arith.constant 0 : index
      %c0_129 = arith.constant 0 : index
      %223 = vector.load %arg2[%c0_127, %c0_128, %c0_129] : memref<2x16x128xf32, #tpu.memory_space<vmem>>, vector<2x16x128xf32>
      %cst_130 = arith.constant 1.000000e-10 : f32
      %224 = vector.broadcast %cst_130 : f32 to vector<2x16x128xf32>
      %225 = arith.addf %223, %224 : vector<2x16x128xf32>
      %cst_131 = arith.constant 5.000000e-01 : f32
      %226 = vector.broadcast %cst_131 : f32 to vector<2x16x128xf32>
      %227 = arith.mulf %226, %225 : vector<2x16x128xf32>
      %c0_132 = arith.constant 0 : index
      %c0_133 = arith.constant 0 : index
      %c0_134 = arith.constant 0 : index
      %228 = vector.load %arg14[%c0_132, %c0_133, %c0_134] : memref<2x16x128xf32, #tpu.memory_space<vmem>>, vector<2x16x128xf32>
      tpu.vector_store %arg14[%c0_132, %c0_133, %c0_134], %227 {strides = array<i32>} : memref<2x16x128xf32, #tpu.memory_space<vmem>>, vector<2x16x128xf32>,
      %cst_135 = arith.constant 1.000000e+00 : f32
      %229 = vector.broadcast %cst_135 : f32 to vector<2x16x128xf32>
      %230 = arith.addf %229, %225 : vector<2x16x128xf32>
      %231 = math.log %230 : vector<2x16x128xf32>
      %cst_136 = arith.constant 1.000000e-03 : f32
      %cst_137 = arith.constant 1.000000e+01 : f32
      %232 = vector.broadcast %cst_136 : f32 to vector<2x16x128xf32>
      %233 = arith.maximumf %232, %231 : vector<2x16x128xf32>
      %234 = vector.broadcast %cst_137 : f32 to vector<2x16x128xf32>
      %235 = arith.minimumf %234, %233 : vector<2x16x128xf32>
      %c0_138 = arith.constant 0 : index
      %c0_139 = arith.constant 0 : index
      %c0_140 = arith.constant 0 : index
      %236 = vector.load %arg13[%c0_138, %c0_139, %c0_140] : memref<2x16x128xf32, #tpu.memory_space<vmem>>, vector<2x16x128xf32>
      tpu.vector_store %arg13[%c0_138, %c0_139, %c0_140], %235 {strides = array<i32>} : memref<2x16x128xf32, #tpu.memory_space<vmem>>, vector<2x16x128xf32>,
      %c0_141 = arith.constant 0 : index
      %c0_142 = arith.constant 0 : index
      %c0_143 = arith.constant 0 : index
      %237 = vector.load %arg11[%c0_141, %c0_142, %c0_143] : memref<2x16x128xf32, #tpu.memory_space<vmem>>, vector<2x16x128xf32>
      tpu.vector_store %arg11[%c0_141, %c0_142, %c0_143], %235 {strides = array<i32>} : memref<2x16x128xf32, #tpu.memory_space<vmem>>, vector<2x16x128xf32>,
      %238 = math.log %225 : vector<2x16x128xf32>
      %c0_144 = arith.constant 0 : index
      %239 = memref.load %arg5[%c0_144] : memref<8xf32, #tpu.memory_space<smem>>
      %240 = vector.broadcast %239 : f32 to vector<2x16x128xf32>
      %241 = arith.mulf %240, %238 : vector<2x16x128xf32>
      %c0_145 = arith.constant 0 : index
      %242 = memref.load %arg6[%c0_145] : memref<8xf32, #tpu.memory_space<smem>>
      %243 = vector.broadcast %242 : f32 to vector<2x16x128xf32>
      %244 = arith.addf %241, %243 : vector<2x16x128xf32>
      %245 = arith.negf %244 : vector<2x16x128xf32>
      %246 = math.exp %245 : vector<2x16x128xf32>
      %cst_146 = arith.constant 1.000000e+00 : f32
      %247 = vector.broadcast %cst_146 : f32 to vector<2x16x128xf32>
      %248 = arith.addf %247, %246 : vector<2x16x128xf32>
      %249 = arith.divf %247, %248 : vector<2x16x128xf32>
      %c0_147 = arith.constant 0 : index
      %c0_148 = arith.constant 0 : index
      %c0_149 = arith.constant 0 : index
      %c0_150 = arith.constant 0 : index
      %250 = vector.load %arg12[%c0_147, %c0_148, %c0_149, %c0_150] : memref<8x2x16x128xf32, #tpu.memory_space<vmem>>, vector<1x2x16x128xf32>
      %251 = vector.shape_cast %250 : vector<1x2x16x128xf32> to vector<2x16x128xf32>
      %252 = vector.shape_cast %249 : vector<2x16x128xf32> to vector<1x2x16x128xf32>
      tpu.vector_store %arg12[%c0_147, %c0_148, %c0_149, %c0_150], %252 {strides = array<i32>} : memref<8x2x16x128xf32, #tpu.memory_space<vmem>>, vector<1x2x16x128xf32>,
      %c1_151 = arith.constant 1 : index
      %253 = memref.load %arg5[%c1_151] : memref<8xf32, #tpu.memory_space<smem>>
      %254 = vector.broadcast %253 : f32 to vector<2x16x128xf32>
      %255 = arith.mulf %254, %238 : vector<2x16x128xf32>
      %c1_152 = arith.constant 1 : index
      %256 = memref.load %arg6[%c1_152] : memref<8xf32, #tpu.memory_space<smem>>
      %257 = vector.broadcast %256 : f32 to vector<2x16x128xf32>
      %258 = arith.addf %255, %257 : vector<2x16x128xf32>
      %259 = arith.negf %258 : vector<2x16x128xf32>
      %260 = math.exp %259 : vector<2x16x128xf32>
      %cst_153 = arith.constant 1.000000e+00 : f32
      %261 = vector.broadcast %cst_153 : f32 to vector<2x16x128xf32>
      %262 = arith.addf %261, %260 : vector<2x16x128xf32>
      %263 = arith.divf %261, %262 : vector<2x16x128xf32>
      %c1_154 = arith.constant 1 : index
      %c0_155 = arith.constant 0 : index
      %c0_156 = arith.constant 0 : index
      %c0_157 = arith.constant 0 : index
      %264 = vector.load %arg12[%c1_154, %c0_155, %c0_156, %c0_157] : memref<8x2x16x128xf32, #tpu.memory_space<vmem>>, vector<1x2x16x128xf32>
      %265 = vector.shape_cast %264 : vector<1x2x16x128xf32> to vector<2x16x128xf32>
      %266 = vector.shape_cast %263 : vector<2x16x128xf32> to vector<1x2x16x128xf32>
      tpu.vector_store %arg12[%c1_154, %c0_155, %c0_156, %c0_157], %266 {strides = array<i32>} : memref<8x2x16x128xf32, #tpu.memory_space<vmem>>, vector<1x2x16x128xf32>,
      %c2_158 = arith.constant 2 : index
      %267 = memref.load %arg5[%c2_158] : memref<8xf32, #tpu.memory_space<smem>>
      %268 = vector.broadcast %267 : f32 to vector<2x16x128xf32>
      %269 = arith.mulf %268, %238 : vector<2x16x128xf32>
      %c2_159 = arith.constant 2 : index
      %270 = memref.load %arg6[%c2_159] : memref<8xf32, #tpu.memory_space<smem>>
      %271 = vector.broadcast %270 : f32 to vector<2x16x128xf32>
      %272 = arith.addf %269, %271 : vector<2x16x128xf32>
      %273 = arith.negf %272 : vector<2x16x128xf32>
      %274 = math.exp %273 : vector<2x16x128xf32>
      %cst_160 = arith.constant 1.000000e+00 : f32
      %275 = vector.broadcast %cst_160 : f32 to vector<2x16x128xf32>
      %276 = arith.addf %275, %274 : vector<2x16x128xf32>
      %277 = arith.divf %275, %276 : vector<2x16x128xf32>
      %c2_161 = arith.constant 2 : index
      %c0_162 = arith.constant 0 : index
      %c0_163 = arith.constant 0 : index
      %c0_164 = arith.constant 0 : index
      %278 = vector.load %arg12[%c2_161, %c0_162, %c0_163, %c0_164] : memref<8x2x16x128xf32, #tpu.memory_space<vmem>>, vector<1x2x16x128xf32>
      %279 = vector.shape_cast %278 : vector<1x2x16x128xf32> to vector<2x16x128xf32>
      %280 = vector.shape_cast %277 : vector<2x16x128xf32> to vector<1x2x16x128xf32>
      tpu.vector_store %arg12[%c2_161, %c0_162, %c0_163, %c0_164], %280 {strides = array<i32>} : memref<8x2x16x128xf32, #tpu.memory_space<vmem>>, vector<1x2x16x128xf32>,
      %c3_165 = arith.constant 3 : index
      %281 = memref.load %arg5[%c3_165] : memref<8xf32, #tpu.memory_space<smem>>
      %282 = vector.broadcast %281 : f32 to vector<2x16x128xf32>
      %283 = arith.mulf %282, %238 : vector<2x16x128xf32>
      %c3_166 = arith.constant 3 : index
      %284 = memref.load %arg6[%c3_166] : memref<8xf32, #tpu.memory_space<smem>>
      %285 = vector.broadcast %284 : f32 to vector<2x16x128xf32>
      %286 = arith.addf %283, %285 : vector<2x16x128xf32>
      %287 = arith.negf %286 : vector<2x16x128xf32>
      %288 = math.exp %287 : vector<2x16x128xf32>
      %cst_167 = arith.constant 1.000000e+00 : f32
      %289 = vector.broadcast %cst_167 : f32 to vector<2x16x128xf32>
      %290 = arith.addf %289, %288 : vector<2x16x128xf32>
      %291 = arith.divf %289, %290 : vector<2x16x128xf32>
      %c3_168 = arith.constant 3 : index
      %c0_169 = arith.constant 0 : index
      %c0_170 = arith.constant 0 : index
      %c0_171 = arith.constant 0 : index
      %292 = vector.load %arg12[%c3_168, %c0_169, %c0_170, %c0_171] : memref<8x2x16x128xf32, #tpu.memory_space<vmem>>, vector<1x2x16x128xf32>
      %293 = vector.shape_cast %292 : vector<1x2x16x128xf32> to vector<2x16x128xf32>
      %294 = vector.shape_cast %291 : vector<2x16x128xf32> to vector<1x2x16x128xf32>
      tpu.vector_store %arg12[%c3_168, %c0_169, %c0_170, %c0_171], %294 {strides = array<i32>} : memref<8x2x16x128xf32, #tpu.memory_space<vmem>>, vector<1x2x16x128xf32>,
      %c4_172 = arith.constant 4 : index
      %295 = memref.load %arg5[%c4_172] : memref<8xf32, #tpu.memory_space<smem>>
      %296 = vector.broadcast %295 : f32 to vector<2x16x128xf32>
      %297 = arith.mulf %296, %238 : vector<2x16x128xf32>
      %c4_173 = arith.constant 4 : index
      %298 = memref.load %arg6[%c4_173] : memref<8xf32, #tpu.memory_space<smem>>
      %299 = vector.broadcast %298 : f32 to vector<2x16x128xf32>
      %300 = arith.addf %297, %299 : vector<2x16x128xf32>
      %301 = arith.negf %300 : vector<2x16x128xf32>
      %302 = math.exp %301 : vector<2x16x128xf32>
      %cst_174 = arith.constant 1.000000e+00 : f32
      %303 = vector.broadcast %cst_174 : f32 to vector<2x16x128xf32>
      %304 = arith.addf %303, %302 : vector<2x16x128xf32>
      %305 = arith.divf %303, %304 : vector<2x16x128xf32>
      %c4_175 = arith.constant 4 : index
      %c0_176 = arith.constant 0 : index
      %c0_177 = arith.constant 0 : index
      %c0_178 = arith.constant 0 : index
      %306 = vector.load %arg12[%c4_175, %c0_176, %c0_177, %c0_178] : memref<8x2x16x128xf32, #tpu.memory_space<vmem>>, vector<1x2x16x128xf32>
      %307 = vector.shape_cast %306 : vector<1x2x16x128xf32> to vector<2x16x128xf32>
      %308 = vector.shape_cast %305 : vector<2x16x128xf32> to vector<1x2x16x128xf32>
      tpu.vector_store %arg12[%c4_175, %c0_176, %c0_177, %c0_178], %308 {strides = array<i32>} : memref<8x2x16x128xf32, #tpu.memory_space<vmem>>, vector<1x2x16x128xf32>,
      %c5_179 = arith.constant 5 : index
      %309 = memref.load %arg5[%c5_179] : memref<8xf32, #tpu.memory_space<smem>>
      %310 = vector.broadcast %309 : f32 to vector<2x16x128xf32>
      %311 = arith.mulf %310, %238 : vector<2x16x128xf32>
      %c5_180 = arith.constant 5 : index
      %312 = memref.load %arg6[%c5_180] : memref<8xf32, #tpu.memory_space<smem>>
      %313 = vector.broadcast %312 : f32 to vector<2x16x128xf32>
      %314 = arith.addf %311, %313 : vector<2x16x128xf32>
      %315 = arith.negf %314 : vector<2x16x128xf32>
      %316 = math.exp %315 : vector<2x16x128xf32>
      %cst_181 = arith.constant 1.000000e+00 : f32
      %317 = vector.broadcast %cst_181 : f32 to vector<2x16x128xf32>
      %318 = arith.addf %317, %316 : vector<2x16x128xf32>
      %319 = arith.divf %317, %318 : vector<2x16x128xf32>
      %c5_182 = arith.constant 5 : index
      %c0_183 = arith.constant 0 : index
      %c0_184 = arith.constant 0 : index
      %c0_185 = arith.constant 0 : index
      %320 = vector.load %arg12[%c5_182, %c0_183, %c0_184, %c0_185] : memref<8x2x16x128xf32, #tpu.memory_space<vmem>>, vector<1x2x16x128xf32>
      %321 = vector.shape_cast %320 : vector<1x2x16x128xf32> to vector<2x16x128xf32>
      %322 = vector.shape_cast %319 : vector<2x16x128xf32> to vector<1x2x16x128xf32>
      tpu.vector_store %arg12[%c5_182, %c0_183, %c0_184, %c0_185], %322 {strides = array<i32>} : memref<8x2x16x128xf32, #tpu.memory_space<vmem>>, vector<1x2x16x128xf32>,
      %c6_186 = arith.constant 6 : index
      %323 = memref.load %arg5[%c6_186] : memref<8xf32, #tpu.memory_space<smem>>
      %324 = vector.broadcast %323 : f32 to vector<2x16x128xf32>
      %325 = arith.mulf %324, %238 : vector<2x16x128xf32>
      %c6_187 = arith.constant 6 : index
      %326 = memref.load %arg6[%c6_187] : memref<8xf32, #tpu.memory_space<smem>>
      %327 = vector.broadcast %326 : f32 to vector<2x16x128xf32>
      %328 = arith.addf %325, %327 : vector<2x16x128xf32>
      %329 = arith.negf %328 : vector<2x16x128xf32>
      %330 = math.exp %329 : vector<2x16x128xf32>
      %cst_188 = arith.constant 1.000000e+00 : f32
      %331 = vector.broadcast %cst_188 : f32 to vector<2x16x128xf32>
      %332 = arith.addf %331, %330 : vector<2x16x128xf32>
      %333 = arith.divf %331, %332 : vector<2x16x128xf32>
      %c6_189 = arith.constant 6 : index
      %c0_190 = arith.constant 0 : index
      %c0_191 = arith.constant 0 : index
      %c0_192 = arith.constant 0 : index
      %334 = vector.load %arg12[%c6_189, %c0_190, %c0_191, %c0_192] : memref<8x2x16x128xf32, #tpu.memory_space<vmem>>, vector<1x2x16x128xf32>
      %335 = vector.shape_cast %334 : vector<1x2x16x128xf32> to vector<2x16x128xf32>
      %336 = vector.shape_cast %333 : vector<2x16x128xf32> to vector<1x2x16x128xf32>
      tpu.vector_store %arg12[%c6_189, %c0_190, %c0_191, %c0_192], %336 {strides = array<i32>} : memref<8x2x16x128xf32, #tpu.memory_space<vmem>>, vector<1x2x16x128xf32>,
      %c7_193 = arith.constant 7 : index
      %337 = memref.load %arg5[%c7_193] : memref<8xf32, #tpu.memory_space<smem>>
      %338 = vector.broadcast %337 : f32 to vector<2x16x128xf32>
      %339 = arith.mulf %338, %238 : vector<2x16x128xf32>
      %c7_194 = arith.constant 7 : index
      %340 = memref.load %arg6[%c7_194] : memref<8xf32, #tpu.memory_space<smem>>
      %341 = vector.broadcast %340 : f32 to vector<2x16x128xf32>
      %342 = arith.addf %339, %341 : vector<2x16x128xf32>
      %343 = arith.negf %342 : vector<2x16x128xf32>
      %344 = math.exp %343 : vector<2x16x128xf32>
      %cst_195 = arith.constant 1.000000e+00 : f32
      %345 = vector.broadcast %cst_195 : f32 to vector<2x16x128xf32>
      %346 = arith.addf %345, %344 : vector<2x16x128xf32>
      %347 = arith.divf %345, %346 : vector<2x16x128xf32>
      %c7_196 = arith.constant 7 : index
      %c0_197 = arith.constant 0 : index
      %c0_198 = arith.constant 0 : index
      %c0_199 = arith.constant 0 : index
      %348 = vector.load %arg12[%c7_196, %c0_197, %c0_198, %c0_199] : memref<8x2x16x128xf32, #tpu.memory_space<vmem>>, vector<1x2x16x128xf32>
      %349 = vector.shape_cast %348 : vector<1x2x16x128xf32> to vector<2x16x128xf32>
      %350 = vector.shape_cast %347 : vector<2x16x128xf32> to vector<1x2x16x128xf32>
      tpu.vector_store %arg12[%c7_196, %c0_197, %c0_198, %c0_199], %350 {strides = array<i32>} : memref<8x2x16x128xf32, #tpu.memory_space<vmem>>, vector<1x2x16x128xf32>,
      %cst_200 = arith.constant 0.000000e+00 : f32
      %351 = vector.broadcast %cst_200 : f32 to vector<16x128xf32>
      %c0_201 = arith.constant 0 : index
      %c0_202 = arith.constant 0 : index
      %352 = vector.load %arg15[%c0_201, %c0_202] : memref<16x128xf32, #tpu.memory_space<vmem>>, vector<16x128xf32>
      tpu.vector_store %arg15[%c0_201, %c0_202], %351 {strides = array<i32>} : memref<16x128xf32, #tpu.memory_space<vmem>>, vector<16x128xf32>,
    } else {
    }
    %c0 = arith.constant 0 : index
    %3 = memref.load %arg7[%c0] : memref<1xf32, #tpu.memory_space<smem>>
    %c0_1 = arith.constant 0 : index
    %c0_2 = arith.constant 0 : index
    %c0_3 = arith.constant 0 : index
    %c0_4 = arith.constant 0 : index
    %4 = vector.load %arg3[%c0_1, %c0_2, %c0_3, %c0_4] : memref<1x2x16x128xf32, #tpu.memory_space<vmem>>, vector<1x1x16x128xf32>
    %5 = vector.shape_cast %4 : vector<1x1x16x128xf32> to vector<16x128xf32>
    %c0_5 = arith.constant 0 : index
    %c0_6 = arith.constant 0 : index
    %c0_7 = arith.constant 0 : index
    %6 = vector.load %arg14[%c0_5, %c0_6, %c0_7] : memref<2x16x128xf32, #tpu.memory_space<vmem>>, vector<1x16x128xf32>
    %7 = vector.shape_cast %6 : vector<1x16x128xf32> to vector<16x128xf32>
    %8 = arith.cmpf ogt, %5, %7 : vector<16x128xf32>
    %9 = arith.extui %8 : vector<16x128xi1> to vector<16x128xi32>
    %10 = arith.sitofp %9 : vector<16x128xi32> to vector<16x128xf32>
    %c2_i32 = arith.constant 2 : i32
    %11 = arith.muli %arg1, %c2_i32 : i32
    %c0_i32_8 = arith.constant 0 : i32
    %12 = arith.addi %11, %c0_i32_8 : i32
    %c8_i32 = arith.constant 8 : i32
    %13 = arith.muli %12, %c8_i32 : i32
    %14 = arith.index_cast %13 : i32 to index
    %15 = memref.load %arg4[%14] : memref<32xf32, #tpu.memory_space<smem>>
    %c0_9 = arith.constant 0 : index
    %c0_10 = arith.constant 0 : index
    %c0_11 = arith.constant 0 : index
    %c0_12 = arith.constant 0 : index
    %16 = vector.load %arg12[%c0_9, %c0_10, %c0_11, %c0_12] : memref<8x2x16x128xf32, #tpu.memory_space<vmem>>, vector<1x1x16x128xf32>
    %17 = vector.shape_cast %16 : vector<1x1x16x128xf32> to vector<16x128xf32>
    %18 = vector.broadcast %15 : f32 to vector<16x128xf32>
    %19 = arith.mulf %18, %17 : vector<16x128xf32>
    %c1_i32 = arith.constant 1 : i32
    %20 = arith.addi %13, %c1_i32 : i32
    %21 = arith.index_cast %20 : i32 to index
    %22 = memref.load %arg4[%21] : memref<32xf32, #tpu.memory_space<smem>>
    %c1 = arith.constant 1 : index
    %c0_13 = arith.constant 0 : index
    %c0_14 = arith.constant 0 : index
    %c0_15 = arith.constant 0 : index
    %23 = vector.load %arg12[%c1, %c0_13, %c0_14, %c0_15] : memref<8x2x16x128xf32, #tpu.memory_space<vmem>>, vector<1x1x16x128xf32>
    %24 = vector.shape_cast %23 : vector<1x1x16x128xf32> to vector<16x128xf32>
    %25 = vector.broadcast %22 : f32 to vector<16x128xf32>
    %26 = arith.mulf %25, %24 : vector<16x128xf32>
    %27 = arith.addf %19, %26 : vector<16x128xf32>
    %c2_i32_16 = arith.constant 2 : i32
    %28 = arith.addi %13, %c2_i32_16 : i32
    %29 = arith.index_cast %28 : i32 to index
    %30 = memref.load %arg4[%29] : memref<32xf32, #tpu.memory_space<smem>>
    %c2 = arith.constant 2 : index
    %c0_17 = arith.constant 0 : index
    %c0_18 = arith.constant 0 : index
    %c0_19 = arith.constant 0 : index
    %31 = vector.load %arg12[%c2, %c0_17, %c0_18, %c0_19] : memref<8x2x16x128xf32, #tpu.memory_space<vmem>>, vector<1x1x16x128xf32>
    %32 = vector.shape_cast %31 : vector<1x1x16x128xf32> to vector<16x128xf32>
    %33 = vector.broadcast %30 : f32 to vector<16x128xf32>
    %34 = arith.mulf %33, %32 : vector<16x128xf32>
    %35 = arith.addf %27, %34 : vector<16x128xf32>
    %c3_i32 = arith.constant 3 : i32
    %36 = arith.addi %13, %c3_i32 : i32
    %37 = arith.index_cast %36 : i32 to index
    %38 = memref.load %arg4[%37] : memref<32xf32, #tpu.memory_space<smem>>
    %c3 = arith.constant 3 : index
    %c0_20 = arith.constant 0 : index
    %c0_21 = arith.constant 0 : index
    %c0_22 = arith.constant 0 : index
    %39 = vector.load %arg12[%c3, %c0_20, %c0_21, %c0_22] : memref<8x2x16x128xf32, #tpu.memory_space<vmem>>, vector<1x1x16x128xf32>
    %40 = vector.shape_cast %39 : vector<1x1x16x128xf32> to vector<16x128xf32>
    %41 = vector.broadcast %38 : f32 to vector<16x128xf32>
    %42 = arith.mulf %41, %40 : vector<16x128xf32>
    %43 = arith.addf %35, %42 : vector<16x128xf32>
    %c4_i32 = arith.constant 4 : i32
    %44 = arith.addi %13, %c4_i32 : i32
    %45 = arith.index_cast %44 : i32 to index
    %46 = memref.load %arg4[%45] : memref<32xf32, #tpu.memory_space<smem>>
    %c4 = arith.constant 4 : index
    %c0_23 = arith.constant 0 : index
    %c0_24 = arith.constant 0 : index
    %c0_25 = arith.constant 0 : index
    %47 = vector.load %arg12[%c4, %c0_23, %c0_24, %c0_25] : memref<8x2x16x128xf32, #tpu.memory_space<vmem>>, vector<1x1x16x128xf32>
    %48 = vector.shape_cast %47 : vector<1x1x16x128xf32> to vector<16x128xf32>
    %49 = vector.broadcast %46 : f32 to vector<16x128xf32>
    %50 = arith.mulf %49, %48 : vector<16x128xf32>
    %51 = arith.addf %43, %50 : vector<16x128xf32>
    %c5_i32 = arith.constant 5 : i32
    %52 = arith.addi %13, %c5_i32 : i32
    %53 = arith.index_cast %52 : i32 to index
    %54 = memref.load %arg4[%53] : memref<32xf32, #tpu.memory_space<smem>>
    %c5 = arith.constant 5 : index
    %c0_26 = arith.constant 0 : index
    %c0_27 = arith.constant 0 : index
    %c0_28 = arith.constant 0 : index
    %55 = vector.load %arg12[%c5, %c0_26, %c0_27, %c0_28] : memref<8x2x16x128xf32, #tpu.memory_space<vmem>>, vector<1x1x16x128xf32>
    %56 = vector.shape_cast %55 : vector<1x1x16x128xf32> to vector<16x128xf32>
    %57 = vector.broadcast %54 : f32 to vector<16x128xf32>
    %58 = arith.mulf %57, %56 : vector<16x128xf32>
    %59 = arith.addf %51, %58 : vector<16x128xf32>
    %c6_i32 = arith.constant 6 : i32
    %60 = arith.addi %13, %c6_i32 : i32
    %61 = arith.index_cast %60 : i32 to index
    %62 = memref.load %arg4[%61] : memref<32xf32, #tpu.memory_space<smem>>
    %c6 = arith.constant 6 : index
    %c0_29 = arith.constant 0 : index
    %c0_30 = arith.constant 0 : index
    %c0_31 = arith.constant 0 : index
    %63 = vector.load %arg12[%c6, %c0_29, %c0_30, %c0_31] : memref<8x2x16x128xf32, #tpu.memory_space<vmem>>, vector<1x1x16x128xf32>
    %64 = vector.shape_cast %63 : vector<1x1x16x128xf32> to vector<16x128xf32>
    %65 = vector.broadcast %62 : f32 to vector<16x128xf32>
    %66 = arith.mulf %65, %64 : vector<16x128xf32>
    %67 = arith.addf %59, %66 : vector<16x128xf32>
    %c7_i32 = arith.constant 7 : i32
    %68 = arith.addi %13, %c7_i32 : i32
    %69 = arith.index_cast %68 : i32 to index
    %70 = memref.load %arg4[%69] : memref<32xf32, #tpu.memory_space<smem>>
    %c7 = arith.constant 7 : index
    %c0_32 = arith.constant 0 : index
    %c0_33 = arith.constant 0 : index
    %c0_34 = arith.constant 0 : index
    %71 = vector.load %arg12[%c7, %c0_32, %c0_33, %c0_34] : memref<8x2x16x128xf32, #tpu.memory_space<vmem>>, vector<1x1x16x128xf32>
    %72 = vector.shape_cast %71 : vector<1x1x16x128xf32> to vector<16x128xf32>
    %73 = vector.broadcast %70 : f32 to vector<16x128xf32>
    %74 = arith.mulf %73, %72 : vector<16x128xf32>
    %75 = arith.addf %67, %74 : vector<16x128xf32>
    %76 = vector.broadcast %3 : f32 to vector<16x128xf32>
    %77 = arith.addf %75, %76 : vector<16x128xf32>
    %78 = math.absf %77 : vector<16x128xf32>
    %cst = arith.constant 0.000000e+00 : f32
    %79 = vector.broadcast %cst : f32 to vector<16x128xf32>
    %80 = arith.subf %79, %78 : vector<16x128xf32>
    %81 = math.exp %80 : vector<16x128xf32>
    %cst_35 = arith.constant 1.000000e+00 : f32
    %82 = vector.broadcast %cst_35 : f32 to vector<16x128xf32>
    %83 = arith.addf %82, %81 : vector<16x128xf32>
    %84 = tpu.reciprocal %83 {approx = true} : vector<16x128xf32> -> vector<16x128xf32>
    %cst_36 = arith.constant 0.000000e+00 : f32
    %85 = vector.broadcast %cst_36 : f32 to vector<16x128xf32>
    %86 = arith.cmpf oge, %77, %85 : vector<16x128xf32>
    %cst_37 = arith.constant 1.000000e+00 : f32
    %87 = vector.broadcast %cst_37 : f32 to vector<16x128xf32>
    %88 = arith.subf %87, %84 : vector<16x128xf32>
    %89 = arith.select %86, %84, %88 : vector<16x128xi1>, vector<16x128xf32>
    %cst_38 = arith.constant 0.000000e+00 : f32
    %90 = vector.broadcast %cst_38 : f32 to vector<16x128xf32>
    %91 = arith.maximumf %77, %90 : vector<16x128xf32>
    %92 = arith.mulf %10, %77 : vector<16x128xf32>
    %93 = arith.subf %91, %92 : vector<16x128xf32>
    %cst_39 = arith.constant 1.000000e+00 : f32
    %94 = vector.broadcast %cst_39 : f32 to vector<16x128xf32>
    %95 = arith.addf %94, %81 : vector<16x128xf32>
    %96 = math.log %95 : vector<16x128xf32>
    %97 = arith.addf %93, %96 : vector<16x128xf32>
    %98 = arith.truncf %89 : vector<16x128xf32> to vector<16x128xbf16>
    %c0_40 = arith.constant 0 : index
    %c0_41 = arith.constant 0 : index
    %c0_42 = arith.constant 0 : index
    %c0_43 = arith.constant 0 : index
    %99 = vector.load %arg9[%c0_40, %c0_41, %c0_42, %c0_43] : memref<1x2x16x128xbf16, #tpu.memory_space<vmem>>, vector<1x1x16x128xbf16>
    %100 = vector.shape_cast %99 : vector<1x1x16x128xbf16> to vector<16x128xbf16>
    %101 = vector.shape_cast %98 : vector<16x128xbf16> to vector<1x1x16x128xbf16>
    tpu.vector_store %arg9[%c0_40, %c0_41, %c0_42, %c0_43], %101 {strides = array<i32>} : memref<1x2x16x128xbf16, #tpu.memory_space<vmem>>, vector<1x1x16x128xbf16>,
    %102 = arith.truncf %10 : vector<16x128xf32> to vector<16x128xbf16>
    %c0_44 = arith.constant 0 : index
    %c0_45 = arith.constant 0 : index
    %c0_46 = arith.constant 0 : index
    %c0_47 = arith.constant 0 : index
    %103 = vector.load %arg10[%c0_44, %c0_45, %c0_46, %c0_47] : memref<1x2x16x128xbf16, #tpu.memory_space<vmem>>, vector<1x1x16x128xbf16>
    %104 = vector.shape_cast %103 : vector<1x1x16x128xbf16> to vector<16x128xbf16>
    %105 = vector.shape_cast %102 : vector<16x128xbf16> to vector<1x1x16x128xbf16>
    tpu.vector_store %arg10[%c0_44, %c0_45, %c0_46, %c0_47], %105 {strides = array<i32>} : memref<1x2x16x128xbf16, #tpu.memory_space<vmem>>, vector<1x1x16x128xbf16>,
    %c0_48 = arith.constant 0 : index
    %c0_49 = arith.constant 0 : index
    %106 = vector.load %arg15[%c0_48, %c0_49] : memref<16x128xf32, #tpu.memory_space<vmem>>, vector<16x128xf32>
    %c0_50 = arith.constant 0 : index
    %c0_51 = arith.constant 0 : index
    %c0_52 = arith.constant 0 : index
    %107 = vector.load %arg13[%c0_50, %c0_51, %c0_52] : memref<2x16x128xf32, #tpu.memory_space<vmem>>, vector<1x16x128xf32>
    %108 = vector.shape_cast %107 : vector<1x16x128xf32> to vector<16x128xf32>
    %109 = arith.mulf %108, %97 : vector<16x128xf32>
    %110 = arith.addf %106, %109 : vector<16x128xf32>
    %c0_53 = arith.constant 0 : index
    %c0_54 = arith.constant 0 : index
    %111 = vector.load %arg15[%c0_53, %c0_54] : memref<16x128xf32, #tpu.memory_space<vmem>>, vector<16x128xf32>
    tpu.vector_store %arg15[%c0_53, %c0_54], %110 {strides = array<i32>} : memref<16x128xf32, #tpu.memory_space<vmem>>, vector<16x128xf32>,
    %c0_55 = arith.constant 0 : index
    %c1_56 = arith.constant 1 : index
    %c0_57 = arith.constant 0 : index
    %c0_58 = arith.constant 0 : index
    %112 = vector.load %arg3[%c0_55, %c1_56, %c0_57, %c0_58] : memref<1x2x16x128xf32, #tpu.memory_space<vmem>>, vector<1x1x16x128xf32>
    %113 = vector.shape_cast %112 : vector<1x1x16x128xf32> to vector<16x128xf32>
    %c1_59 = arith.constant 1 : index
    %c0_60 = arith.constant 0 : index
    %c0_61 = arith.constant 0 : index
    %114 = vector.load %arg14[%c1_59, %c0_60, %c0_61] : memref<2x16x128xf32, #tpu.memory_space<vmem>>, vector<1x16x128xf32>
    %115 = vector.shape_cast %114 : vector<1x16x128xf32> to vector<16x128xf32>
    %116 = arith.cmpf ogt, %113, %115 : vector<16x128xf32>
    %117 = arith.extui %116 : vector<16x128xi1> to vector<16x128xi32>
    %118 = arith.sitofp %117 : vector<16x128xi32> to vector<16x128xf32>
    %c2_i32_62 = arith.constant 2 : i32
    %119 = arith.muli %arg1, %c2_i32_62 : i32
    %c1_i32_63 = arith.constant 1 : i32
    %120 = arith.addi %119, %c1_i32_63 : i32
    %c8_i32_64 = arith.constant 8 : i32
    %121 = arith.muli %120, %c8_i32_64 : i32
    %122 = arith.index_cast %121 : i32 to index
    %123 = memref.load %arg4[%122] : memref<32xf32, #tpu.memory_space<smem>>
    %c0_65 = arith.constant 0 : index
    %c1_66 = arith.constant 1 : index
    %c0_67 = arith.constant 0 : index
    %c0_68 = arith.constant 0 : index
    %124 = vector.load %arg12[%c0_65, %c1_66, %c0_67, %c0_68] : memref<8x2x16x128xf32, #tpu.memory_space<vmem>>, vector<1x1x16x128xf32>
    %125 = vector.shape_cast %124 : vector<1x1x16x128xf32> to vector<16x128xf32>
    %126 = vector.broadcast %123 : f32 to vector<16x128xf32>
    %127 = arith.mulf %126, %125 : vector<16x128xf32>
    %c1_i32_69 = arith.constant 1 : i32
    %128 = arith.addi %121, %c1_i32_69 : i32
    %129 = arith.index_cast %128 : i32 to index
    %130 = memref.load %arg4[%129] : memref<32xf32, #tpu.memory_space<smem>>
    %c1_70 = arith.constant 1 : index
    %c1_71 = arith.constant 1 : index
    %c0_72 = arith.constant 0 : index
    %c0_73 = arith.constant 0 : index
    %131 = vector.load %arg12[%c1_70, %c1_71, %c0_72, %c0_73] : memref<8x2x16x128xf32, #tpu.memory_space<vmem>>, vector<1x1x16x128xf32>
    %132 = vector.shape_cast %131 : vector<1x1x16x128xf32> to vector<16x128xf32>
    %133 = vector.broadcast %130 : f32 to vector<16x128xf32>
    %134 = arith.mulf %133, %132 : vector<16x128xf32>
    %135 = arith.addf %127, %134 : vector<16x128xf32>
    %c2_i32_74 = arith.constant 2 : i32
    %136 = arith.addi %121, %c2_i32_74 : i32
    %137 = arith.index_cast %136 : i32 to index
    %138 = memref.load %arg4[%137] : memref<32xf32, #tpu.memory_space<smem>>
    %c2_75 = arith.constant 2 : index
    %c1_76 = arith.constant 1 : index
    %c0_77 = arith.constant 0 : index
    %c0_78 = arith.constant 0 : index
    %139 = vector.load %arg12[%c2_75, %c1_76, %c0_77, %c0_78] : memref<8x2x16x128xf32, #tpu.memory_space<vmem>>, vector<1x1x16x128xf32>
    %140 = vector.shape_cast %139 : vector<1x1x16x128xf32> to vector<16x128xf32>
    %141 = vector.broadcast %138 : f32 to vector<16x128xf32>
    %142 = arith.mulf %141, %140 : vector<16x128xf32>
    %143 = arith.addf %135, %142 : vector<16x128xf32>
    %c3_i32_79 = arith.constant 3 : i32
    %144 = arith.addi %121, %c3_i32_79 : i32
    %145 = arith.index_cast %144 : i32 to index
    %146 = memref.load %arg4[%145] : memref<32xf32, #tpu.memory_space<smem>>
    %c3_80 = arith.constant 3 : index
    %c1_81 = arith.constant 1 : index
    %c0_82 = arith.constant 0 : index
    %c0_83 = arith.constant 0 : index
    %147 = vector.load %arg12[%c3_80, %c1_81, %c0_82, %c0_83] : memref<8x2x16x128xf32, #tpu.memory_space<vmem>>, vector<1x1x16x128xf32>
    %148 = vector.shape_cast %147 : vector<1x1x16x128xf32> to vector<16x128xf32>
    %149 = vector.broadcast %146 : f32 to vector<16x128xf32>
    %150 = arith.mulf %149, %148 : vector<16x128xf32>
    %151 = arith.addf %143, %150 : vector<16x128xf32>
    %c4_i32_84 = arith.constant 4 : i32
    %152 = arith.addi %121, %c4_i32_84 : i32
    %153 = arith.index_cast %152 : i32 to index
    %154 = memref.load %arg4[%153] : memref<32xf32, #tpu.memory_space<smem>>
    %c4_85 = arith.constant 4 : index
    %c1_86 = arith.constant 1 : index
    %c0_87 = arith.constant 0 : index
    %c0_88 = arith.constant 0 : index
    %155 = vector.load %arg12[%c4_85, %c1_86, %c0_87, %c0_88] : memref<8x2x16x128xf32, #tpu.memory_space<vmem>>, vector<1x1x16x128xf32>
    %156 = vector.shape_cast %155 : vector<1x1x16x128xf32> to vector<16x128xf32>
    %157 = vector.broadcast %154 : f32 to vector<16x128xf32>
    %158 = arith.mulf %157, %156 : vector<16x128xf32>
    %159 = arith.addf %151, %158 : vector<16x128xf32>
    %c5_i32_89 = arith.constant 5 : i32
    %160 = arith.addi %121, %c5_i32_89 : i32
    %161 = arith.index_cast %160 : i32 to index
    %162 = memref.load %arg4[%161] : memref<32xf32, #tpu.memory_space<smem>>
    %c5_90 = arith.constant 5 : index
    %c1_91 = arith.constant 1 : index
    %c0_92 = arith.constant 0 : index
    %c0_93 = arith.constant 0 : index
    %163 = vector.load %arg12[%c5_90, %c1_91, %c0_92, %c0_93] : memref<8x2x16x128xf32, #tpu.memory_space<vmem>>, vector<1x1x16x128xf32>
    %164 = vector.shape_cast %163 : vector<1x1x16x128xf32> to vector<16x128xf32>
    %165 = vector.broadcast %162 : f32 to vector<16x128xf32>
    %166 = arith.mulf %165, %164 : vector<16x128xf32>
    %167 = arith.addf %159, %166 : vector<16x128xf32>
    %c6_i32_94 = arith.constant 6 : i32
    %168 = arith.addi %121, %c6_i32_94 : i32
    %169 = arith.index_cast %168 : i32 to index
    %170 = memref.load %arg4[%169] : memref<32xf32, #tpu.memory_space<smem>>
    %c6_95 = arith.constant 6 : index
    %c1_96 = arith.constant 1 : index
    %c0_97 = arith.constant 0 : index
    %c0_98 = arith.constant 0 : index
    %171 = vector.load %arg12[%c6_95, %c1_96, %c0_97, %c0_98] : memref<8x2x16x128xf32, #tpu.memory_space<vmem>>, vector<1x1x16x128xf32>
    %172 = vector.shape_cast %171 : vector<1x1x16x128xf32> to vector<16x128xf32>
    %173 = vector.broadcast %170 : f32 to vector<16x128xf32>
    %174 = arith.mulf %173, %172 : vector<16x128xf32>
    %175 = arith.addf %167, %174 : vector<16x128xf32>
    %c7_i32_99 = arith.constant 7 : i32
    %176 = arith.addi %121, %c7_i32_99 : i32
    %177 = arith.index_cast %176 : i32 to index
    %178 = memref.load %arg4[%177] : memref<32xf32, #tpu.memory_space<smem>>
    %c7_100 = arith.constant 7 : index
    %c1_101 = arith.constant 1 : index
    %c0_102 = arith.constant 0 : index
    %c0_103 = arith.constant 0 : index
    %179 = vector.load %arg12[%c7_100, %c1_101, %c0_102, %c0_103] : memref<8x2x16x128xf32, #tpu.memory_space<vmem>>, vector<1x1x16x128xf32>
    %180 = vector.shape_cast %179 : vector<1x1x16x128xf32> to vector<16x128xf32>
    %181 = vector.broadcast %178 : f32 to vector<16x128xf32>
    %182 = arith.mulf %181, %180 : vector<16x128xf32>
    %183 = arith.addf %175, %182 : vector<16x128xf32>
    %184 = vector.broadcast %3 : f32 to vector<16x128xf32>
    %185 = arith.addf %183, %184 : vector<16x128xf32>
    %186 = math.absf %185 : vector<16x128xf32>
    %cst_104 = arith.constant 0.000000e+00 : f32
    %187 = vector.broadcast %cst_104 : f32 to vector<16x128xf32>
    %188 = arith.subf %187, %186 : vector<16x128xf32>
    %189 = math.exp %188 : vector<16x128xf32>
    %cst_105 = arith.constant 1.000000e+00 : f32
    %190 = vector.broadcast %cst_105 : f32 to vector<16x128xf32>
    %191 = arith.addf %190, %189 : vector<16x128xf32>
    %192 = tpu.reciprocal %191 {approx = true} : vector<16x128xf32> -> vector<16x128xf32>
    %cst_106 = arith.constant 0.000000e+00 : f32
    %193 = vector.broadcast %cst_106 : f32 to vector<16x128xf32>
    %194 = arith.cmpf oge, %185, %193 : vector<16x128xf32>
    %cst_107 = arith.constant 1.000000e+00 : f32
    %195 = vector.broadcast %cst_107 : f32 to vector<16x128xf32>
    %196 = arith.subf %195, %192 : vector<16x128xf32>
    %197 = arith.select %194, %192, %196 : vector<16x128xi1>, vector<16x128xf32>
    %cst_108 = arith.constant 0.000000e+00 : f32
    %198 = vector.broadcast %cst_108 : f32 to vector<16x128xf32>
    %199 = arith.maximumf %185, %198 : vector<16x128xf32>
    %200 = arith.mulf %118, %185 : vector<16x128xf32>
    %201 = arith.subf %199, %200 : vector<16x128xf32>
    %cst_109 = arith.constant 1.000000e+00 : f32
    %202 = vector.broadcast %cst_109 : f32 to vector<16x128xf32>
    %203 = arith.addf %202, %189 : vector<16x128xf32>
    %204 = math.log %203 : vector<16x128xf32>
    %205 = arith.addf %201, %204 : vector<16x128xf32>
    %206 = arith.truncf %197 : vector<16x128xf32> to vector<16x128xbf16>
    %c0_110 = arith.constant 0 : index
    %c1_111 = arith.constant 1 : index
    %c0_112 = arith.constant 0 : index
    %c0_113 = arith.constant 0 : index
    %207 = vector.load %arg9[%c0_110, %c1_111, %c0_112, %c0_113] : memref<1x2x16x128xbf16, #tpu.memory_space<vmem>>, vector<1x1x16x128xbf16>
    %208 = vector.shape_cast %207 : vector<1x1x16x128xbf16> to vector<16x128xbf16>
    %209 = vector.shape_cast %206 : vector<16x128xbf16> to vector<1x1x16x128xbf16>
    tpu.vector_store %arg9[%c0_110, %c1_111, %c0_112, %c0_113], %209 {strides = array<i32>} : memref<1x2x16x128xbf16, #tpu.memory_space<vmem>>, vector<1x1x16x128xbf16>,
    %210 = arith.truncf %118 : vector<16x128xf32> to vector<16x128xbf16>
    %c0_114 = arith.constant 0 : index
    %c1_115 = arith.constant 1 : index
    %c0_116 = arith.constant 0 : index
    %c0_117 = arith.constant 0 : index
    %211 = vector.load %arg10[%c0_114, %c1_115, %c0_116, %c0_117] : memref<1x2x16x128xbf16, #tpu.memory_space<vmem>>, vector<1x1x16x128xbf16>
    %212 = vector.shape_cast %211 : vector<1x1x16x128xbf16> to vector<16x128xbf16>
    %213 = vector.shape_cast %210 : vector<16x128xbf16> to vector<1x1x16x128xbf16>
    tpu.vector_store %arg10[%c0_114, %c1_115, %c0_116, %c0_117], %213 {strides = array<i32>} : memref<1x2x16x128xbf16, #tpu.memory_space<vmem>>, vector<1x1x16x128xbf16>,
    %c0_118 = arith.constant 0 : index
    %c0_119 = arith.constant 0 : index
    %214 = vector.load %arg15[%c0_118, %c0_119] : memref<16x128xf32, #tpu.memory_space<vmem>>, vector<16x128xf32>
    %c1_120 = arith.constant 1 : index
    %c0_121 = arith.constant 0 : index
    %c0_122 = arith.constant 0 : index
    %215 = vector.load %arg13[%c1_120, %c0_121, %c0_122] : memref<2x16x128xf32, #tpu.memory_space<vmem>>, vector<1x16x128xf32>
    %216 = vector.shape_cast %215 : vector<1x16x128xf32> to vector<16x128xf32>
    %217 = arith.mulf %216, %205 : vector<16x128xf32>
    %218 = arith.addf %214, %217 : vector<16x128xf32>
    %c0_123 = arith.constant 0 : index
    %c0_124 = arith.constant 0 : index
    %219 = vector.load %arg15[%c0_123, %c0_124] : memref<16x128xf32, #tpu.memory_space<vmem>>, vector<16x128xf32>
    tpu.vector_store %arg15[%c0_123, %c0_124], %218 {strides = array<i32>} : memref<16x128xf32, #tpu.memory_space<vmem>>, vector<16x128xf32>,
    %c1_i32_125 = arith.constant 1 : i32
    %220 = arith.cmpi eq, %arg1, %c1_i32_125 : i32
    %221 = arith.extui %220 : i1 to i32
    %c0_i32_126 = arith.constant 0 : i32
    %222 = arith.cmpi ne, %221, %c0_i32_126 : i32
    scf.if %222 {
      %c0_127 = arith.constant 0 : index
      %c0_128 = arith.constant 0 : index
      %223 = vector.load %arg15[%c0_127, %c0_128] : memref<16x128xf32, #tpu.memory_space<vmem>>, vector<16x128xf32>
      %224 = vector.shape_cast %223 : vector<16x128xf32> to vector<1x16x128xf32>
      %cst_129 = arith.constant dense<0.000000e+00> : vector<1xf32>
      %225 = vector.multi_reduction <add>, %224, %cst_129 [1, 2] : vector<1x16x128xf32> to vector<1xf32>
      %226 = vector.shape_cast %225 : vector<1xf32> to vector<1x1x1xf32>
      %227 = vector.extract %226[0, 0, 0] : f32 from vector<1x1x1xf32>
      %228 = vector.broadcast %227 : f32 to vector<1x1x1xf32>
      %c0_130 = arith.constant 0 : index
      %c0_131 = arith.constant 0 : index
      %c0_132 = arith.constant 0 : index
      %229 = vector.load %arg8[%c0_130, %c0_131, %c0_132] : memref<1x1x1xf32, #tpu.memory_space<vmem>>, vector<1x1x1xf32>
      tpu.vector_store %arg8[%c0_130, %c0_131, %c0_132], %228 {strides = array<i32>} : memref<1x1x1xf32, #tpu.memory_space<vmem>>, vector<1x1x1xf32>,
    } else {
    }
    return
  }
  func.func @transform_0(%arg0: i32, %arg1: i32) -> (i32, i32, i32) {
    %c0_i32 = arith.constant 0 : i32
    %c0_i32_0 = arith.constant 0 : i32
    %c0_i32_1 = arith.constant 0 : i32
    return %c0_i32, %arg0, %c0_i32_0 : i32, i32, i32
  }
  func.func @transform_1(%arg0: i32, %arg1: i32) -> (i32, i32, i32, i32) {
    %c0_i32 = arith.constant 0 : i32
    %c0_i32_0 = arith.constant 0 : i32
    %c0_i32_1 = arith.constant 0 : i32
    return %arg1, %c0_i32, %arg0, %c0_i32_0 : i32, i32, i32, i32
  }
  func.func @transform_2(%arg0: i32, %arg1: i32) -> i32 {
    %c0_i32 = arith.constant 0 : i32
    %c0_i32_0 = arith.constant 0 : i32
    return %c0_i32 : i32
  }
  func.func @transform_3(%arg0: i32, %arg1: i32) -> i32 {
    %c0_i32 = arith.constant 0 : i32
    %c0_i32_0 = arith.constant 0 : i32
    return %c0_i32 : i32
  }
  func.func @transform_4(%arg0: i32, %arg1: i32) -> i32 {
    %c0_i32 = arith.constant 0 : i32
    %c0_i32_0 = arith.constant 0 : i32
    return %c0_i32 : i32
  }
  func.func @transform_5(%arg0: i32, %arg1: i32) -> i32 {
    %c0_i32 = arith.constant 0 : i32
    %c0_i32_0 = arith.constant 0 : i32
    return %c0_i32 : i32
  }
  func.func @transform_6(%arg0: i32, %arg1: i32) -> (i32, i32, i32) {
    %c0_i32 = arith.constant 0 : i32
    %c0_i32_0 = arith.constant 0 : i32
    %c0_i32_1 = arith.constant 0 : i32
    return %arg0, %c0_i32, %c0_i32_0 : i32, i32, i32
  }
  func.func @transform_7(%arg0: i32, %arg1: i32) -> (i32, i32, i32, i32) {
    %c0_i32 = arith.constant 0 : i32
    %c0_i32_0 = arith.constant 0 : i32
    %c0_i32_1 = arith.constant 0 : i32
    return %arg1, %c0_i32, %arg0, %c0_i32_0 : i32, i32, i32, i32
  }
  func.func @transform_8(%arg0: i32, %arg1: i32) -> (i32, i32, i32, i32) {
    %c0_i32 = arith.constant 0 : i32
    %c0_i32_0 = arith.constant 0 : i32
    %c0_i32_1 = arith.constant 0 : i32
    return %arg1, %c0_i32, %arg0, %c0_i32_0 : i32, i32, i32, i32
  }
  func.func @transform_9(%arg0: i32, %arg1: i32) -> (i32, i32, i32) {
    %c0_i32 = arith.constant 0 : i32
    %c0_i32_0 = arith.constant 0 : i32
    %c0_i32_1 = arith.constant 0 : i32
    return %c0_i32, %arg0, %c0_i32_0 : i32, i32, i32
  }
}

</mosaic_0001>

<bundles_post_ra>
// kernel: tpu_custom_call.1
= control target key start
LH: loop header
LB: loop body
LE: loop exit
PB: predicated region body
PF: predicated region fallthrough
CT: control target
= control target key end

     0   :  { %s3014_s0 = inlined_call_operand.hbm [shape: f32[2,32,128], index: 0, kind: input, shape index: {}]   ;;  %s3015_s1 = inlined_call_operand.hbm [shape: f32[2,2,32,128], index: 1, kind: input, shape index: {}]   ;;  %s3016_s2 = inlined_call_operand.vmem [shape: f32[32], index: 2, kind: input, shape index: {}]   ;;  %s3017_s3 = inlined_call_operand.vmem [shape: f32[8], index: 3, kind: input, shape index: {}]   ;;  %s3018_s4 = inlined_call_operand.vmem [shape: f32[8], index: 4, kind: input, shape index: {}]   ;;  %s3019_s5 = inlined_call_operand.<no memory space> [shape: f32[1], index: 5, kind: input, shape index: {}]   ;;  %s3020_s6 = inlined_call_operand.vmem [shape: f32[2,1,1], index: 6, kind: output, shape index: {0}]   ;;  %s3021_s7 = inlined_call_operand.hbm [shape: bf16[2,2,32,128], index: 7, kind: output, shape index: {1}]   ;;  %s3022_s8 = inlined_call_operand.hbm [shape: bf16[2,2,32,128], index: 8, kind: output, shape index: {2}]   ;;  %s3023_s9 = inlined_call_operand.hbm [shape: f32[2,32,128], index: 9, kind: output, shape index: {3}]  }
   0x1   :  { %3043 = sst [smem:[#allocation50_spill]] %s3016_s2 }
   0x2   :  { %3044 = sst [smem:[#allocation51_spill]] %s3017_s3 }
   0x3   :  { %3045 = sst [smem:[#allocation52_spill]] %s3018_s4 }
   0x4   :  { %3046 = sst [smem:[#allocation53_spill]] %s3021_s7 }
   0x5   :  { %3047 = sst [smem:[#allocation54_spill]] %s3022_s8 }
   0x6   :  { %3048 = sst [smem:[#allocation55_spill]] %s3023_s9 }
   0x7   :  { %15 = sst [smem:[#allocation6]] %s3019_s5 }
   0x8   :  { %16 = vsyncpa [#allocation8], 0 }
   0x9   :  { %18 = vsyncpa [#allocation8 + $0x1], 0 }
   0xa   :  { %19 = vsyncpa [#allocation12], 0 }
   0xb   :  { %21 = vsyncpa [#allocation12 + $0x1], 0 }
   0xc   :  { %22 = vsyncpa [#allocation10], 0 }
   0xd   :  { %23 = vsyncpa [#allocation15], 0 }
   0xe   :  { %24 = vsyncpa [#allocation9], 0 }
   0xf   :  { %26 = vsyncpa [#allocation9 + $0x1], 0 }
  0x10   :  { %27 = vsyncpa [#allocation19], 0 }
  0x11   :  { %29 = vsyncpa [#allocation19 + $0x1], 0  ;;  %s2393_s11 = smov 0   ;;  %s2395_s12 = smov 0  }
  0x12   :  { %s2397_s13 = smov 0   ;;  %s2399_s14 = smov 0  }
  0x13   :  { %s2401_s15 = smov 0   ;;  %s2403_s5 = smov 0  }
  0x14   :  { %s2405_s16 = smov 0   ;;  %s2407_s17 = smov 0  }
  0x15   :  { %s2409_s18 = smov 0   ;;  %s2411_s19 = smov 0  }
  0x16   :  { %s2413_s20 = smov 0  }
  0x17 LB: > { %3049 = sst [smem:[#allocation40_spill]] %s2260_s11  ;;  %s2449_s21 = sadd.s32 4294967295, %s2300_s20   ;;  %s2300_s20 = sphi %s2413_s20, %s35_s20   ;;  %s2296_s19 = sphi %s2411_s19, %s3112_s19   ;;  %s2292_s18 = sphi %s2409_s18, %s3111_s18   ;;  %s2288_s17 = sphi %s2407_s17, %s3110_s17   ;;  %s2284_s16 = sphi %s2405_s16, %s3109_s16   ;;  %s2280_s5 = sphi %s2403_s5, %s3108_s5   ;;  %s2276_s15 = sphi %s2401_s15, %s3107_s15   ;;  %s2272_s14 = sphi %s2399_s14, %s3106_s14   ;;  %s2268_s13 = sphi %s2397_s13, %s3105_s13   ;;  %s2264_s12 = sphi %s2395_s12, %s3104_s12   ;;  %s2260_s11 = sphi %s2393_s11, %s3103_s11  }
  0x18   : > { %3050 = sst [smem:[#allocation41_spill]] %s2280_s5  ;;  %s44_s23 = sadd.s32 1, %s2292_s18 }
  0x19   : > { %3051 = sst [smem:[#allocation42_spill]] %s2300_s20  ;;  %s47_s24 = sadd.s32 1, %s2296_s19 }
  0x1a   : > { %p45_p0 = scmp.ge.s32.totalorder %s44_s23, 2  ;;  %s54_s25 = sadd.s32 1, %s2280_s5 }
  0x1b   : > { %p61_p1 = scmp.ne.s32.totalorder %s2280_s5, %s2276_s15  ;;  %p62_p2 = scmp.eq.s32.totalorder %s2300_s20, 0 }
  0x1c   : > { %s3114_s23 = smov (%p45_p0, %s44_s23), 0  ;;  %s3116_s24 = smov (!%p45_p0, %s47_s24), %s2296_s19 }
  0x1d   : > { %3052 = sst [smem:[#allocation43_spill]] %s3114_s23  ;;  %p2466_p3 = por %p62_p2, %p61_p1 }
  0x1e   : > { %p3026_p4 = scmp.ne.s32.totalorder %s2276_s15, %s2272_s14  ;;  %p49_p5 = scmp.ge.s32.totalorder %s3116_s24, 2 }
  0x1f   : > { %s3053_s26 = scalar_select %p2466_p3, 1, 0 }
  0x20   : > { %p3027_p6 = scmp.eq.s32.totalorder %s2449_s21, 0  ;;  %s77_s27 = ssub.s32 %s2292_s18, %s3114_s23 }
  0x21   : > { %s82_s28 = sadd.s32 1, %s2268_s13  ;;  %s3118_s24 = smov (%p49_p5, %s3116_s24), 0 }
  0x22   : > { %3054 = sst [smem:[#allocation44_spill]] %s3118_s24  ;;  %p2483_p7 = por %p3027_p6, %p3026_p4 }
  0x23   : > { %p89_p8 = scmp.ne.s32.totalorder %s2268_s13, %s2264_s12  ;;  %s51_s30 = ssub.s32 %s2296_s19, %s3118_s24 }
  0x24   : > { %s3055_s29 = scalar_select %p2483_p7, 1, 0 }
  0x25   : > { %p95_p9 = scmp.ne.s32.totalorder %s2264_s12, %s2260_s11  ;;  %p52_p10 = scmp.eq.s32.totalorder %s51_s30, 0 }
  0x26   : > { %s79_s10 = sor.u32 %s77_s27, %s51_s30  ;;  %p2498_p12 = por %p89_p8, %p62_p2 }
  0x27   : > { %p80_p11 = scmp.eq.s32.totalorder %s79_s10, 0  ;;  %p2513_p13 = por %p95_p9, %p3027_p6 }
  0x28   : > { %s3056_s22 = scalar_select %p2498_p12, 1, 0 }
  0x29   : > { %s2503_s23 = scalar_select %p52_p10, %s2280_s5, %s54_s25  }
  0x2a   : > { %s2506_s9 = scalar_select %p80_p11, %s2268_s13, %s82_s28  }
  0x2b   : > { %3057 = sst [smem:[#allocation45_spill]] %s2503_s23  ;;  %p231_p0 = scmp.eq.s32.totalorder %s2449_s21, 3 }
  0x2c   : > { %3058 = sst [smem:[#allocation46_spill]] %s2506_s9  ;;  %s3060_s27 = sadd.s32 4294967294, %s2300_s20  }
  0x2d   : > { %s3059_s24 = scalar_select %p2513_p13, 1, 0 }
  0x2e   : > { %p237_p5 = scmp.eq.s32.totalorder %s3060_s27, 3  ;;  %p1626_p4 = scmp.ge.s32.totalorder %s2300_s20, 1 }
  0x2f   : > { %p2524_p2 = por %p231_p0, %p89_p8  ;;  %p2531_p10 = por %p231_p0, %p61_p1 }
  0x30   : > { %p2538_p11 = por %p237_p5, %p95_p9  ;;  %p3066_p6 = scmp.ne.s32.totalorder %s2276_s15, %s2272_s14 }
  0x31   : > { %s3061_s30 = scalar_select %p2524_p2, 1, 0 }
  0x32   : > { %s3062_s25 = scalar_select %p2531_p10, 1, 0 }
  0x33   : > { %s3064_s28 = scalar_select %p2538_p11, 1, 0 }
  0x34   : > { %3063 = sst [smem:[#allocation47_spill]] %s3062_s25  ;;  %p2545_p13 = por %p237_p5, %p3066_p6 }
  0x35   : > { %3065 = sst [smem:[#allocation48_spill]] %s3064_s28  ;;  %p298_p7 = scmp.lt.s32.totalorder %s2300_s20, 5 }
  0x36   : > { %s3067_s10 = scalar_select %p2545_p13, 1, 0 }
  0x37   : > { %s3069_s3 = sld [smem:[#allocation51_spill]]  ;;  %p2553_p8 = pnand %p1626_p4, %p298_p7 }
  0x38   : > { %3068 = sst [smem:[#allocation49_spill]] %s3067_s10  ;;  %s3071_s2 = sld [smem:[#allocation50_spill]] }
  0x39   : > { %s3070_s8 = scalar_select %p2553_p8, 1, 0 }
  0x3a   : > { %p1820_p1 = pneg %p2553_p8  ;;  %p3072_p6 = scmp.eq.s32.totalorder %s2449_s21, 0 }
  0x3b   : > { %s3074_s4 = sld [smem:[#allocation52_spill]] }
  0x3c   : > { %p2564_p9 = pnand %p1820_p1, %p3072_p6 }
  0x3d   : > { %s322_s9 = sshll.u32 %s3069_s3, 4  ;;  %s323_s9 = int_to_ptr.vmem [resolvable:$true] %s322_s9 }
  0x3e   : > { %s311_s14 = sshll.u32 %s3071_s2, 4  ;;  %s2141_s25 = scalar_lea.vmem %s323_s9, 16  ;;  %s312_s14 = int_to_ptr.vmem [resolvable:$true] %s311_s14 }
  0x3f   : > { %p2142_p4 = scmp.ne.s32.totalorder %s323_s9, %s2141_s25  ;;  %p2143_p7 = pneg %p2564_p9 }
  0x40   : > { %p2149_p1 = scmp.lt.s32.totalorder %s323_s9, %s323_s9  ;;  %p2150_p6 = scmp.lt.s32.totalorder %s2141_s25, %s2141_s25 }
  0x41   : > { %s333_s3 = sshll.u32 %s3074_s4, 4  ;;  %p2144_p0 = pnand %p2143_p7, %p2142_p4  ;;  %s2571_s3 = int_to_ptr.vmem [resolvable:$true] %s333_s3 }
  0x42   : > { %p2151_p13 = por %p2150_p6, %p2149_p1 }
  0x43   : > { %p2145_p5 = pneg %p2144_p0 }
  0x45   : > { %p2152_p11 = pnand %p2151_p13, %p2145_p5 }
  0x47   : > { %2155 = shalt.err (!%p2152_p11)
}
  0x48   : > { %s2302_s11 = smov [#allocation14]   ;;  %s2156_s28 = scalar_lea.vmem %s312_s14, 16 }
  0x49   : > { %1826 = dma.vmem_to_smem (!%p2564_p9), %s323_s9, 16, %s2302_s11, [#allocation15]  }
  0x4a   : > { %p2157_p10 = scmp.ne.s32.totalorder %s312_s14, %s2156_s28  ;;  %p2164_p12 = scmp.lt.s32.totalorder %s312_s14, %s312_s14 }
  0x4b   : > { %p2165_p3 = scmp.lt.s32.totalorder %s2156_s28, %s2156_s28 }
  0x4c   : > { %p2159_p2 = pnand %p2157_p10, %p2143_p7 }
  0x4d   : > { %p2166_p4 = por %p2165_p3, %p2164_p12 }
  0x4e   : > { %p2160_p8 = pneg %p2159_p2 }
  0x50   : > { %p2167_p0 = pnand %p2166_p4, %p2160_p8 }
  0x52   : > { %2170 = shalt.err (!%p2167_p0)
}
  0x53   : > { %s2303_s25 = smov [#allocation13]   ;;  %s2171_s9 = scalar_lea.vmem %s2571_s3, 16 }
  0x54   : > { %1823 = dma.vmem_to_smem (!%p2564_p9), %s312_s14, 16, %s2303_s25, [#allocation10]  }
  0x55   : > { %p2172_p13 = scmp.ne.s32.totalorder %s2571_s3, %s2171_s9  ;;  %p2179_p2 = scmp.lt.s32.totalorder %s2571_s3, %s2571_s3 }
  0x56   : > { %p2180_p5 = scmp.lt.s32.totalorder %s2171_s9, %s2171_s9 }
  0x57   : > { %p2174_p11 = pnand %p2172_p13, %p2143_p7 }
  0x58   : > { %p2181_p3 = por %p2180_p5, %p2179_p2 }
  0x59   : > { %p2175_p10 = pneg %p2174_p11 }
  0x5b   : > { %p2182_p12 = pnand %p2181_p3, %p2175_p10 }
  0x5d   : > { %2185 = shalt.err (!%p2182_p12)
}
  0x5e   : > { %s2304_s23 = smov [#allocation16]   ;;  %p1630_p8 = scmp.ge.s32.totalorder %s2300_s20, 4 }
  0x5f   : > { %1829 = dma.vmem_to_smem (!%p2564_p9), %s2571_s3, 16, %s2304_s23, [#allocation15]  }
  0x60   : > { %343 = sbr.rel (%p1630_p8) target bundleno = 135 (0x87), region = 32 }
  0x67   : > { %s347_s14 = sand.u32 1, %s2280_s5   ;;  %s1733_s27 = sshll.u32 %s2296_s19, 8 }
  0x68   : > { %s1631_s11 = sshll.u32 %s347_s14, 5  ;;  %s357_s10 = scalar_lea.hbm %s3014_s0, %s1733_s27 }
  0x69   : > { %p3075_p7 = scmp.ne.s32.totalorder %s3053_s26, 0  ;;  %s351_s9 = scalar_lea.vmem [#allocation7], %s1631_s11 }
  0x6a   : > { %s370_s23 = sshll.u32 %s351_s9, 4  ;;  %s2305_s4 = smov 512   ;;  %s371_s23 = int_to_ptr.vmem [resolvable:$true] %s370_s23 }
  0x6b   : > { %s1772_s3 = scalar_select %p3075_p7, [#allocation0], [#allocation31] }
  0x6c   : > { %1773 = sst [smem:[#allocation22]] (%p3075_p7), %s2305_s4  ;;  %s2306_s5 = smov 256  }
  0x6d   : > { %s362_s2 = sld [smem:[%s1772_s3]]   ;;  %s2307_s20 = smov 2  }
  0x6e   : > { %1774 = sst [smem:[#allocation22 + $0x1]] (%p3075_p7), %s2306_s5  ;;  %s2308_s7 = smov 128  }
  0x6f   : > { %1775 = sst [smem:[#allocation22 + $0x2]] (%p3075_p7), %s2307_s20  ;;  %s2309_s11 = smov 8  }
  0x70   : > { %1776 = sst [smem:[#allocation22 + $0x3]] (%p3075_p7), %s2308_s7  ;;  %s348_s25 = scalar_lea.sflag [#allocation8], %s347_s14 }
  0x71   : > { %1777 = sst [smem:[#allocation22 + $0x4]] (%p3075_p7), %s2308_s7  ;;  %s2310_s3 = smov [#allocation21]  }
  0x72   : > { %1778 = sst [smem:[#allocation22 + $0x5]] (%p3075_p7), %s2309_s11 }
  0x73   : > { %s1634_s27 = sshll.u32 %s362_s2, 26 }
  0x74   : > { %s1635_s28 = sadd.s32 134217728, %s1634_s27 }
  0x75   : > { %1779 = dma.general (%p3075_p7), %s357_s10, 512, %s371_s23, %s348_s25, %s2310_s3, [#allocation22], %s1635_s28, 0  }
  0x76   : > { %s393_s4 = sand.u32 1, %s2268_s13   ;;  %s1637_s5 = sshll.u32 %s2296_s19, 1 }
  0x77   : > { %s1636_s20 = sshll.u32 %s393_s4, 5  ;;  %s1638_s2 = sshll.u32 %s2292_s18, 3 }
  0x78   : > { %s403_s7 = sadd.s32 %s1638_s2, %s1637_s5  ;;  %s397_s9 = scalar_lea.vmem [#allocation11], %s1636_s20 }
  0x79   : > { %s418_s27 = sshll.u32 %s397_s9, 4  ;;  %s1639_s14 = sshll.u32 %s403_s7, 7  ;;  %s419_s27 = int_to_ptr.vmem [resolvable:$true] %s418_s27 }
  0x7a   : > { %p3076_p9 = scmp.ne.s32.totalorder %s3056_s22, 0  ;;  %s2311_s10 = smov 512  }
  0x7b   : > { %s2312_s11 = smov 256   ;;  %s2313_s28 = smov 2  }
  0x7c   : > { %s1780_s26 = scalar_select %p3076_p9, [#allocation0], [#allocation32] }
  0x7d   : > { %1781 = sst [smem:[#allocation24]] (%p3076_p9), %s2311_s10  ;;  %s2314_s25 = smov 128  }
  0x7e   : > { %s410_s23 = sld [smem:[%s1780_s26]]   ;;  %s405_s20 = scalar_lea.hbm %s3015_s1, %s1639_s14 }
  0x7f   : > { %1782 = sst [smem:[#allocation24 + $0x1]] (%p3076_p9), %s2312_s11  ;;  %s2315_s2 = smov 8  }
  0x80   : > { %1783 = sst [smem:[#allocation24 + $0x2]] (%p3076_p9), %s2313_s28  ;;  %s394_s26 = scalar_lea.sflag [#allocation12], %s393_s4 }
  0x81   : > { %1784 = sst [smem:[#allocation24 + $0x3]] (%p3076_p9), %s2314_s25  ;;  %s2316_s10 = smov [#allocation23]  }
  0x82   : > { %1785 = sst [smem:[#allocation24 + $0x4]] (%p3076_p9), %s2314_s25 }
  0x83   : > { %1786 = sst [smem:[#allocation24 + $0x5]] (%p3076_p9), %s2315_s2 }
  0x84   : > { %s1640_s7 = sshll.u32 %s410_s23, 26 }
  0x85   : > { %s1641_s9 = sadd.s32 134217728, %s1640_s7 }
  0x86   : > { %1787 = dma.general (%p3076_p9), %s405_s20, 512, %s419_s27, %s394_s26, %s2316_s10, [#allocation24], %s1641_s9, 0  }
  0x87 PF: > { %p3077_p1 = scmp.ne.s32.totalorder %s3070_s8, 0 }
  0x88   : > { %s445_s11 = sand.u32 (!%p3077_p1), 1, %s2276_s15   ;;  %p3078_p6 = scmp.ne.s32.totalorder (!%p3077_p1), %s3055_s29, 0 }
  0x89   : > { %443 = sbr.rel (%p3077_p1) target bundleno = 597 (0x255), region = 44  ;;  %s1643_s28 = sshll.u32 (!%p3077_p1), %s445_s11, 5 }
  0x8a   : > { %s446_s14 = scalar_lea.sflag (!%p3077_p1), [#allocation8], %s445_s11  ;;  %s2642_s3 = scalar_lea.vmem (!%p3077_p1), [#allocation7], %s1643_s28 }
  0x90   : > { %2231 = dma.done.wait (%p3078_p6), %s446_s14, 512  }
  0x91   : > { %2233 = vsyncadd (%p3078_p6), %s446_s14, 4294966784  ;;  %s2649_s22 = sand.u32 1, %s2264_s12   ;;  %p3079_p4 = scmp.ne.s32.totalorder %s3059_s24, 0 }
  0x92   : > { %s1644_s8 = sshll.u32 %s2649_s22, 5  ;;  %s455_s4 = scalar_lea.sflag [#allocation12], %s2649_s22 }
  0x93   : > { %s2653_s27 = scalar_lea.vmem [#allocation11], %s1644_s8 }
  0x94   : > { %2235 = dma.done.wait (%p3079_p4), %s455_s4, 512  }
  0x95   : > { %2237 = vsyncadd (%p3079_p4), %s455_s4, 4294966784  ;;  %p3080_p0 = scmp.eq.s32.totalorder %s2449_s21, 0 }
  0x97   : > { %2239 = dma.done.wait (%p3080_p0), [#allocation10], 16   ;;  %p3081_p13 = pmov %p3080_p0 }
  0x98   : > { %p3082_p11 = pmov %p3080_p0 }
  0x99   : > { %2241 = vsyncadd (%p3081_p13), [#allocation10], 4294967280 }
  0x9a   : > { %2243 = dma.done.wait (%p3082_p11), [#allocation15], 32   ;;  %p3083_p10 = pmov %p3080_p0 }
  0x9c   : > { %2245 = vsyncadd (%p3083_p10), [#allocation15], 4294967264 }
  0x9d   : > { %475 = sfence }
  0x9e   : > { %s1648_s29 = sshll.u32 %s2649_s22, 4  ;;  %p526_p2 = scmp.lt.s32.totalorder %s2288_s17, 1 }
  0x9f   : > { %s2676_s20 = scalar_lea.vmem [#allocation17], %s1648_s29  ;;  %s2678_s2 = scalar_lea.vmem [#allocation18], %s1648_s29 }
  0xa0   : > { %s2670_s24 = scalar_select %p526_p2, %s2288_s17, 1 }
  0xa1   : > { %s2680_s7 = scalar_lea.vmem [#allocation20], %s1643_s28  ;;  %p1651_p5 = scmp.ne.s32.totalorder %s2284_s16, 0 }
  0xa2   : > { %v536_v0 = vld [vmem:[%s2642_s3] sm:$0xff] (!%p1651_p5)  ;;  %v537_v1 = vld [vmem:[%s2642_s3 + $0x8] sm:$0xff] (!%p1651_p5)  ;;  %v538_v2 = vld [vmem:[%s2642_s3 + $0x10] sm:$0xff] (!%p1651_p5)  ;;  %v2317_v6 = vmov (!%p1651_p5), 0.0   ;;  %s588_s9 = sld [smem:[#allocation14]] (!%p1651_p5)  ;;  %s1656_s26 = sld [smem:[#allocation14 + $0x1]] (!%p1651_p5) }
  0xa3   : > { %535 = sbr.rel (%p1651_p5) target bundleno = 266 (0x10a), region = 68  ;;  %v540_v3 = vadd.f32 (!%p1651_p5), 1e-10, %v536_v0  ;;  %v541_v4 = vadd.f32 (!%p1651_p5), 1e-10, %v537_v1  ;;  %915 = vst [vmem:[#allocation5] sm:$0xff] (!%p1651_p5), %v2317_v6 }
  0xa4   : > { %v542_v5 = vadd.f32 (!%p1651_p5), 1e-10, %v538_v2  ;;  %916 = vst [vmem:[#allocation5 + $0x8] sm:$0xff] (!%p1651_p5), %v2317_v6  ;;  %v539_v7 = vld [vmem:[%s2642_s3 + $0x18] sm:$0xff] (!%p1651_p5)  ;;  %s1662_s10 = sld [smem:[#allocation14 + $0x2]] (!%p1651_p5)  ;;  %s594_s11 = sld [smem:[#allocation16]] (!%p1651_p5) }
  0xa5   : > { %v544_v8 = vmul.f32 (!%p1651_p5), 0.5, %v540_v3  ;;  %1973 = vlog2.f32 (!%p1651_p5), %v540_v3  ;;  %v545_v9 = vmul.f32 (!%p1651_p5), 0.5, %v541_v4  ;;  %v543_v11 = vadd.f32 (!%p1651_p5), 1e-10, %v539_v7  ;;  %s1657_s28 = sld [smem:[#allocation16 + $0x1]] (!%p1651_p5)  ;;  %s1663_s14 = sld [smem:[#allocation16 + $0x2]] (!%p1651_p5) }
  0xa6   : > { %v546_v10 = vmul.f32 (!%p1651_p5), 0.5, %v542_v5  ;;  %1975 = vlog2.f32 (!%p1651_p5), %v541_v4  ;;  %v552_v12 = vadd.f32 (!%p1651_p5), 1.0, %v540_v3  ;;  %v553_v13 = vadd.f32 (!%p1651_p5), 1.0, %v541_v4  ;;  %s2713_s3 = sld [smem:[#allocation14 + $0x3]] (!%p1651_p5)  ;;  %s1674_s4 = sld [smem:[#allocation14 + $0x4]] (!%p1651_p5) }
  0xa7   : > { %548 = vst [vmem:[#allocation4] sm:$0xff] (!%p1651_p5), %v544_v8  ;;  %549 = vst [vmem:[#allocation4 + $0x8] sm:$0xff] (!%p1651_p5), %v545_v9  ;;  %1977 = vlog2.f32 (!%p1651_p5), %v542_v5  ;;  %v554_v14 = vadd.f32 (!%p1651_p5), 1.0, %v542_v5  ;;  %v547_v15 = vmul.f32 (!%p1651_p5), 0.5, %v543_v11  ;;  %v555_v16 = vadd.f32 (!%p1651_p5), 1.0, %v543_v11  ;;  %s2715_s8 = sld [smem:[#allocation16 + $0x3]] (!%p1651_p5) }
  0xa8   : > { %550 = vst [vmem:[#allocation4 + $0x10] sm:$0xff] (!%p1651_p5), %v546_v10  ;;  %1979 = vlog2.f32 (!%p1651_p5), %v543_v11  ;;  %v589_v18 = vstv (!%p1651_p5), %s588_s9  ;;  %v629_v19 = vstv (!%p1651_p5), %s1656_s26  ;;  %s2735_s29 = sld [smem:[#allocation16 + $0x4]] (!%p1651_p5)  ;;  %s2739_s23 = sld [smem:[#allocation14 + $0x5]] (!%p1651_p5) }
  0xa9   : > { %1981 = vlog2.f32 (!%p1651_p5), %v552_v12  ;;  %551 = vst [vmem:[#allocation4 + $0x18] sm:$0xff] (!%p1651_p5), %v547_v15  ;;  %s2743_s25 = sld [smem:[#allocation16 + $0x5]] (!%p1651_p5)  ;;  %s2750_s9 = sld [smem:[#allocation14 + $0x6]] (!%p1651_p5) }
  0xaa   : > { %1983 = vlog2.f32 %v553_v13  ;;  %v2687_v20 = vstv %s1662_s10  ;;  %v595_v25 = vstv %s594_s11  ;;  %s2758_s26 = sld [smem:[#allocation16 + $0x6]]  ;;  %s2761_s10 = sld [smem:[#allocation14 + $0x7]] }
  0xab   : > { %1985 = vlog2.f32 %v554_v14  ;;  %v2693_v26 = vstv %s1657_s28  ;;  %v2695_v27 = vstv %s1663_s14  ;;  %s2766_s11 = sld [smem:[#allocation16 + $0x7]] }
  0xac   : > { %1987 = vlog2.f32 %v555_v16  ;;  %v711_v10 = vstv %s2713_s3 }
  0xaf   : > { %v1974_v17 = vpop.eup %1973 }
  0xb0   : > { %v1976_v21 = vpop.eup %1975  ;;  %v2689_v22 = vmul.f32 0.6931472, %v1974_v17 }
  0xb1   : > { %v1978_v23 = vpop.eup %1977  ;;  %v2691_v24 = vmul.f32 0.6931472, %v1976_v21 }
  0xb2   : > { %v1980_v28 = vpop.eup %1979  ;;  %v2697_v29 = vmul.f32 0.6931472, %v1978_v23  ;;  %v590_v30 = vmul.f32 %v589_v18, %v2689_v22  ;;  %v630_v31 = vmul.f32 %v629_v19, %v2689_v22  ;;  %v671_v32 = vmul.f32 %v2687_v20, %v2689_v22 }
  0xb3   : > { %v1982_v33 = vpop.eup %1981  ;;  %v2703_v34 = vmul.f32 0.6931472, %v1980_v28  ;;  %v591_v35 = vmul.f32 %v589_v18, %v2691_v24  ;;  %v631_v36 = vmul.f32 %v629_v19, %v2691_v24  ;;  %v672_v37 = vmul.f32 %v2687_v20, %v2691_v24 }
  0xb4   : > { %v1984_v38 = vpop.eup %1983  ;;  %v557_v39 = vmul.f32 0.6931472, %v1982_v33  ;;  %v596_v40 = vadd.f32 %v595_v25, %v590_v30  ;;  %v592_v41 = vmul.f32 %v589_v18, %v2697_v29  ;;  %v636_v42 = vadd.f32 %v2693_v26, %v630_v31 }
  0xb5   : > { %v1986_v43 = vpop.eup %1985  ;;  %v559_v44 = vmul.f32 0.6931472, %v1984_v38  ;;  %v597_v45 = vadd.f32 %v595_v25, %v591_v35  ;;  %v593_v46 = vmul.f32 %v589_v18, %v2703_v34  ;;  %v637_v47 = vadd.f32 %v2693_v26, %v631_v36 }
  0xb6   : > { %v1988_v48 = vpop.eup %1987  ;;  %v564_v49 = vmax.f32 %v557_v39, 0.001  ;;  %v561_v50 = vmul.f32 0.6931472, %v1986_v43  ;;  %v1652_v51 = vmul.f32 -1.442695, %v596_v40  ;;  %v598_v52 = vadd.f32 %v595_v25, %v592_v41 }
  0xb7   : > { %v565_v53 = vmax.f32 %v559_v44, 0.001  ;;  %v563_v54 = vmul.f32 0.6931472, %v1988_v48  ;;  %v1653_v55 = vmul.f32 -1.442695, %v597_v45  ;;  %v599_v56 = vadd.f32 %v595_v25, %v593_v46 }
  0xb8   : > { %v568_v57 = vmin.f32 %v564_v49, 10.0  ;;  %v566_v58 = vmax.f32 %v561_v50, 0.001  ;;  %1989 = vpow2.f32 %v1652_v51  ;;  %v1654_v59 = vmul.f32 -1.442695, %v598_v52 }
  0xb9   : > { %v569_v60 = vmin.f32 %v565_v53, 10.0  ;;  %v567_v61 = vmax.f32 %v563_v54, 0.001  ;;  %1991 = vpow2.f32 %v1653_v55  ;;  %v1655_v62 = vmul.f32 -1.442695, %v599_v56 }
  0xba   : > { %572 = vst [vmem:[#allocation3] sm:$0xff] %v568_v57  ;;  %576 = vst [vmem:[%s2680_s7] sm:$0xff] %v568_v57  ;;  %v570_v63 = vmin.f32 %v566_v58, 10.0  ;;  %1993 = vpow2.f32 %v1654_v59  ;;  %v1658_v0 = vmul.f32 -1.442695, %v636_v42  ;;  %v1659_v1 = vmul.f32 -1.442695, %v637_v47 }
  0xbb   : > { %573 = vst [vmem:[#allocation3 + $0x8] sm:$0xff] %v569_v60  ;;  %577 = vst [vmem:[%s2680_s7 + $0x8] sm:$0xff] %v569_v60  ;;  %v571_v2 = vmin.f32 %v567_v61, 10.0  ;;  %1995 = vpow2.f32 %v1655_v62  ;;  %v632_v3 = vmul.f32 %v629_v19, %v2697_v29  ;;  %v633_v4 = vmul.f32 %v629_v19, %v2703_v34 }
  0xbc   : > { %574 = vst [vmem:[#allocation3 + $0x10] sm:$0xff] %v570_v63  ;;  %578 = vst [vmem:[%s2680_s7 + $0x10] sm:$0xff] %v570_v63  ;;  %1997 = vpow2.f32 %v1658_v0  ;;  %v677_v5 = vadd.f32 %v2695_v27, %v671_v32  ;;  %v678_v6 = vadd.f32 %v2695_v27, %v672_v37  ;;  %v673_v7 = vmul.f32 %v2687_v20, %v2697_v29 }
  0xbd   : > { %575 = vst [vmem:[#allocation3 + $0x18] sm:$0xff] %v571_v2  ;;  %579 = vst [vmem:[%s2680_s7 + $0x18] sm:$0xff] %v571_v2  ;;  %1999 = vpow2.f32 %v1659_v1  ;;  %v638_v8 = vadd.f32 %v2693_v26, %v632_v3  ;;  %v639_v9 = vadd.f32 %v2693_v26, %v633_v4  ;;  %v674_v16 = vmul.f32 %v2687_v20, %v2703_v34 }
  0xbe   : > { %v1664_v11 = vmul.f32 -1.442695, %v677_v5  ;;  %v679_v12 = vadd.f32 %v2695_v27, %v673_v7  ;;  %v1665_v15 = vmul.f32 -1.442695, %v678_v6  ;;  %v712_v18 = vmul.f32 %v711_v10, %v2689_v22 }
  0xbf   : > { %v1660_v13 = vmul.f32 -1.442695, %v638_v8  ;;  %v1661_v14 = vmul.f32 -1.442695, %v639_v9  ;;  %v717_v19 = vstv %s2715_s8  ;;  %v680_v26 = vadd.f32 %v2695_v27, %v674_v16 }
  0xc0   : > { %2001 = vpow2.f32 %v1664_v11  ;;  %v1666_v17 = vmul.f32 -1.442695, %v679_v12  ;;  %v713_v28 = vmul.f32 %v711_v10, %v2691_v24  ;;  %v718_v31 = vadd.f32 %v717_v19, %v712_v18 }
  0xc1   : > { %2003 = vpow2.f32 %v1660_v13  ;;  %v714_v35 = vmul.f32 %v711_v10, %v2697_v29  ;;  %v752_v38 = vstv %s1674_s4  ;;  %v1667_v40 = vmul.f32 -1.442695, %v680_v26 }
  0xc2   : > { %v1990_v21 = vpop.eup %1989  ;;  %2005 = vpow2.f32 %v1661_v14  ;;  %v719_v41 = vadd.f32 %v717_v19, %v713_v28  ;;  %v1670_v43 = vmul.f32 -1.442695, %v718_v31  ;;  %v715_v44 = vmul.f32 %v711_v10, %v2703_v34 }
  0xc3   : > { %v1992_v23 = vpop.eup %1991  ;;  %v612_v25 = vadd.f32 1.0, %v1990_v21  ;;  %2007 = vpow2.f32 %v1665_v15  ;;  %v720_v45 = vadd.f32 %v717_v19, %v714_v35  ;;  %v753_v46 = vmul.f32 %v752_v38, %v2689_v22 }
  0xc4   : > { %v1994_v20 = vpop.eup %1993  ;;  %v613_v30 = vadd.f32 1.0, %v1992_v23  ;;  %2009 = vpow2.f32 %v1666_v17  ;;  %v758_v48 = vstv %s2735_s29  ;;  %v754_v49 = vmul.f32 %v752_v38, %v2691_v24 }
  0xc5   : > { %v1996_v32 = vpop.eup %1995  ;;  %2011 = vrcp.f32 %v612_v25  ;;  %v614_v33 = vadd.f32 1.0, %v1994_v20  ;;  %v755_v52 = vmul.f32 %v752_v38, %v2697_v29  ;;  %v793_v53 = vstv %s2739_s23 }
  0xc6   : > { %v1998_v36 = vpop.eup %1997  ;;  %2013 = vrcp.f32 %v613_v30  ;;  %v615_v37 = vadd.f32 1.0, %v1996_v32  ;;  %v1671_v56 = vmul.f32 -1.442695, %v719_v41  ;;  %v721_v57 = vadd.f32 %v717_v19, %v715_v44 }
  0xc7   : > { %v2000_v39 = vpop.eup %1999  ;;  %2015 = vrcp.f32 %v614_v33  ;;  %v652_v27 = vadd.f32 1.0, %v1998_v36  ;;  %v1672_v60 = vmul.f32 -1.442695, %v720_v45  ;;  %v759_v61 = vadd.f32 %v758_v48, %v753_v46 }
  0xc8   : > { %2017 = vrcp.f32 %v615_v37  ;;  %v653_v42 = vadd.f32 1.0, %v2000_v39  ;;  %v760_v0 = vadd.f32 %v758_v48, %v754_v49  ;;  %v756_v1 = vmul.f32 %v752_v38, %v2703_v34 }
  0xc9   : > { %2019 = vrcp.f32 %v652_v27  ;;  %v761_v4 = vadd.f32 %v758_v48, %v755_v52  ;;  %v794_v5 = vmul.f32 %v793_v53, %v2689_v22  ;;  %v1673_v7 = vmul.f32 -1.442695, %v721_v57 }
  0xca   : > { %v2002_v47 = vpop.eup %2001  ;;  %2021 = vrcp.f32 %v653_v42  ;;  %v799_v8 = vstv %s2743_s25  ;;  %v795_v9 = vmul.f32 %v793_v53, %v2691_v24  ;;  %v1676_v11 = vmul.f32 -1.442695, %v759_v61 }
  0xcb   : > { %v2004_v50 = vpop.eup %2003  ;;  %v693_v51 = vadd.f32 1.0, %v2002_v47  ;;  %2023 = vpow2.f32 %v1667_v40  ;;  %v796_v12 = vmul.f32 %v793_v53, %v2697_v29  ;;  %v1677_v14 = vmul.f32 -1.442695, %v760_v0 }
  0xcc   : > { %v2006_v54 = vpop.eup %2005  ;;  %v654_v55 = vadd.f32 1.0, %v2004_v50  ;;  %2025 = vpow2.f32 %v1670_v43  ;;  %v762_v15 = vadd.f32 %v758_v48, %v756_v1  ;;  %v797_v16 = vmul.f32 %v793_v53, %v2703_v34 }
  0xcd   : > { %v2008_v58 = vpop.eup %2007  ;;  %v655_v59 = vadd.f32 1.0, %v2006_v54  ;;  %2027 = vrcp.f32 %v693_v51  ;;  %v1678_v18 = vmul.f32 -1.442695, %v761_v4  ;;  %v800_v19 = vadd.f32 %v799_v8, %v794_v5 }
  0xce   : > { %v2010_v62 = vpop.eup %2009  ;;  %2029 = vrcp.f32 %v654_v55  ;;  %v694_v63 = vadd.f32 1.0, %v2008_v58  ;;  %v801_v23 = vadd.f32 %v799_v8, %v795_v9  ;;  %v802_v26 = vadd.f32 %v799_v8, %v796_v12 }
  0xcf   : > { %v2012_v2 = vpop.eup %2011  ;;  %2031 = vrcp.f32 %v655_v59  ;;  %v695_v3 = vadd.f32 1.0, %v2010_v62  ;;  %v834_v28 = vstv %s2750_s9  ;;  %v1679_v31 = vmul.f32 -1.442695, %v762_v15 }
  0xd0   : > { %v2014_v6 = vpop.eup %2013  ;;  %624 = vst [vmem:[#allocation2] sm:$0xff] %v2012_v2  ;;  %2033 = vrcp.f32 %v694_v63  ;;  %v803_v32 = vadd.f32 %v799_v8, %v797_v16  ;;  %v1682_v36 = vmul.f32 -1.442695, %v800_v19  ;;  %v1683_v38 = vmul.f32 -1.442695, %v801_v23 }
  0xd1   : > { %v2016_v10 = vpop.eup %2015  ;;  %625 = vst [vmem:[#allocation2 + $0x8] sm:$0xff] %v2014_v6  ;;  %2035 = vrcp.f32 %v695_v3  ;;  %v1684_v27 = vmul.f32 -1.442695, %v802_v26  ;;  %v835_v40 = vmul.f32 %v834_v28, %v2689_v22  ;;  %v840_v43 = vstv %s2758_s26 }
  0xd2   : > { %v2018_v13 = vpop.eup %2017  ;;  %626 = vst [vmem:[#allocation2 + $0x10] sm:$0xff] %v2016_v10  ;;  %2037 = vpow2.f32 %v1671_v56  ;;  %v1685_v42 = vmul.f32 -1.442695, %v803_v32  ;;  %v836_v44 = vmul.f32 %v834_v28, %v2691_v24  ;;  %v875_v55 = vstv %s2761_s10 }
  0xd3   : > { %v2020_v17 = vpop.eup %2019  ;;  %627 = vst [vmem:[#allocation2 + $0x18] sm:$0xff] %v2018_v13  ;;  %2039 = vpow2.f32 %v1672_v60  ;;  %v841_v49 = vadd.f32 %v840_v43, %v835_v40  ;;  %v837_v58 = vmul.f32 %v834_v28, %v2697_v29  ;;  %v838_v62 = vmul.f32 %v834_v28, %v2703_v34 }
  0xd4   : > { %v2022_v21 = vpop.eup %2021  ;;  %665 = vst [vmem:[#allocation2 + $0x20] sm:$0xff] %v2020_v17  ;;  %2041 = vpow2.f32 %v1673_v7  ;;  %v842_v52 = vadd.f32 %v840_v43, %v836_v44  ;;  %v876_v2 = vmul.f32 %v875_v55, %v2689_v22  ;;  %v881_v4 = vstv %s2766_s11 }
  0xd5   : > { %v2024_v25 = vpop.eup %2023  ;;  %666 = vst [vmem:[#allocation2 + $0x28] sm:$0xff] %v2022_v21  ;;  %2043 = vpow2.f32 %v1676_v11  ;;  %v1688_v61 = vmul.f32 -1.442695, %v841_v49  ;;  %v877_v5 = vmul.f32 %v875_v55, %v2691_v24  ;;  %v843_v7 = vadd.f32 %v840_v43, %v837_v58 }
  0xd6   : > { %v2026_v20 = vpop.eup %2025  ;;  %v696_v30 = vadd.f32 1.0, %v2024_v25  ;;  %2045 = vpow2.f32 %v1677_v14  ;;  %v1689_v1 = vmul.f32 -1.442695, %v842_v52  ;;  %v878_v8 = vmul.f32 %v875_v55, %v2697_v29 }
  0xd7   : > { %v2028_v33 = vpop.eup %2027  ;;  %v734_v35 = vadd.f32 1.0, %v2026_v20  ;;  %2047 = vpow2.f32 %v1678_v18  ;;  %v844_v11 = vadd.f32 %v840_v43, %v838_v62  ;;  %v879_v12 = vmul.f32 %v875_v55, %v2703_v34 }
  0xd8   : > { %v2030_v37 = vpop.eup %2029  ;;  %706 = vst [vmem:[#allocation2 + $0x40] sm:$0xff] %v2028_v33  ;;  %2049 = vrcp.f32 %v696_v30  ;;  %v882_v14 = vadd.f32 %v881_v4, %v876_v2  ;;  %v883_v24 = vadd.f32 %v881_v4, %v877_v5  ;;  %v1690_v19 = vmul.f32 -1.442695, %v843_v7 }
  0xd9   : > { %v2032_v39 = vpop.eup %2031  ;;  %667 = vst [vmem:[#allocation2 + $0x30] sm:$0xff] %v2030_v37  ;;  %2051 = vrcp.f32 %v734_v35  ;;  %v884_v21 = vadd.f32 %v881_v4, %v878_v8  ;;  %v1691_v25 = vmul.f32 -1.442695, %v844_v11  ;;  %v885_v26 = vadd.f32 %v881_v4, %v879_v12 }
  0xda   : > { %v2034_v41 = vpop.eup %2033  ;;  %668 = vst [vmem:[#allocation2 + $0x38] sm:$0xff] %v2032_v39  ;;  %2053 = vpow2.f32 %v1679_v31  ;;  %v1694_v34 = vmul.f32 -1.442695, %v882_v14  ;;  %v1695_v30 = vmul.f32 -1.442695, %v883_v24 }
  0xdb   : > { %v2036_v45 = vpop.eup %2035  ;;  %707 = vst [vmem:[#allocation2 + $0x48] sm:$0xff] %v2034_v41  ;;  %2055 = vpow2.f32 %v1682_v36  ;;  %v1696_v32 = vmul.f32 -1.442695, %v884_v21  ;;  %v1697_v35 = vmul.f32 -1.442695, %v885_v26 }
  0xdc   : > { %v2038_v46 = vpop.eup %2037  ;;  %708 = vst [vmem:[#allocation2 + $0x50] sm:$0xff] %v2036_v45  ;;  %2057 = vpow2.f32 %v1683_v38 }
  0xdd   : > { %v2040_v47 = vpop.eup %2039  ;;  %v735_v48 = vadd.f32 1.0, %v2038_v46  ;;  %2059 = vpow2.f32 %v1684_v27 }
  0xde   : > { %v2042_v50 = vpop.eup %2041  ;;  %v736_v51 = vadd.f32 1.0, %v2040_v47  ;;  %2061 = vpow2.f32 %v1685_v42 }
  0xdf   : > { %v2044_v53 = vpop.eup %2043  ;;  %2063 = vrcp.f32 %v735_v48  ;;  %v737_v54 = vadd.f32 1.0, %v2042_v50 }
  0xe0   : > { %v2046_v56 = vpop.eup %2045  ;;  %2065 = vrcp.f32 %v736_v51  ;;  %v775_v57 = vadd.f32 1.0, %v2044_v53 }
  0xe1   : > { %v2048_v59 = vpop.eup %2047  ;;  %2067 = vrcp.f32 %v737_v54  ;;  %v776_v60 = vadd.f32 1.0, %v2046_v56 }
  0xe2   : > { %v2050_v63 = vpop.eup %2049  ;;  %2069 = vrcp.f32 %v775_v57  ;;  %v777_v0 = vadd.f32 1.0, %v2048_v59 }
  0xe3   : > { %v2052_v3 = vpop.eup %2051  ;;  %709 = vst [vmem:[#allocation2 + $0x58] sm:$0xff] %v2050_v63  ;;  %2071 = vrcp.f32 %v776_v60 }
  0xe4   : > { %v2054_v6 = vpop.eup %2053  ;;  %747 = vst [vmem:[#allocation2 + $0x60] sm:$0xff] %v2052_v3  ;;  %2073 = vrcp.f32 %v777_v0 }
  0xe5   : > { %v2056_v9 = vpop.eup %2055  ;;  %v778_v10 = vadd.f32 1.0, %v2054_v6  ;;  %2075 = vpow2.f32 %v1688_v61 }
  0xe6   : > { %v2058_v13 = vpop.eup %2057  ;;  %v816_v22 = vadd.f32 1.0, %v2056_v9  ;;  %2077 = vpow2.f32 %v1689_v1 }
  0xe7   : > { %v2060_v15 = vpop.eup %2059  ;;  %2079 = vrcp.f32 %v778_v10  ;;  %v817_v16 = vadd.f32 1.0, %v2058_v13 }
  0xe8   : > { %v2062_v17 = vpop.eup %2061  ;;  %2081 = vrcp.f32 %v816_v22  ;;  %v818_v18 = vadd.f32 1.0, %v2060_v15 }
  0xe9   : > { %v2064_v29 = vpop.eup %2063  ;;  %2083 = vrcp.f32 %v817_v16  ;;  %v819_v23 = vadd.f32 1.0, %v2062_v17 }
  0xea   : > { %v2066_v28 = vpop.eup %2065  ;;  %748 = vst [vmem:[#allocation2 + $0x68] sm:$0xff] %v2064_v29  ;;  %2085 = vrcp.f32 %v818_v18 }
  0xeb   : > { %v2068_v20 = vpop.eup %2067  ;;  %749 = vst [vmem:[#allocation2 + $0x70] sm:$0xff] %v2066_v28  ;;  %2087 = vrcp.f32 %v819_v23 }
  0xec   : > { %v2070_v31 = vpop.eup %2069  ;;  %750 = vst [vmem:[#allocation2 + $0x78] sm:$0xff] %v2068_v20  ;;  %2089 = vpow2.f32 %v1690_v19 }
  0xed   : > { %v2072_v33 = vpop.eup %2071  ;;  %788 = vst [vmem:[#allocation2 + $0x80] sm:$0xff] %v2070_v31  ;;  %2091 = vpow2.f32 %v1691_v25 }
  0xee   : > { %v2074_v36 = vpop.eup %2073  ;;  %789 = vst [vmem:[#allocation2 + $0x88] sm:$0xff] %v2072_v33  ;;  %2093 = vpow2.f32 %v1694_v34 }
  0xef   : > { %v2076_v37 = vpop.eup %2075  ;;  %790 = vst [vmem:[#allocation2 + $0x90] sm:$0xff] %v2074_v36  ;;  %2095 = vpow2.f32 %v1695_v30 }
  0xf0   : > { %v2078_v38 = vpop.eup %2077  ;;  %v857_v39 = vadd.f32 1.0, %v2076_v37  ;;  %2097 = vpow2.f32 %v1696_v32 }
  0xf1   : > { %v2080_v27 = vpop.eup %2079  ;;  %v858_v40 = vadd.f32 1.0, %v2078_v38  ;;  %2099 = vpow2.f32 %v1697_v35 }
  0xf2   : > { %v2082_v41 = vpop.eup %2081  ;;  %791 = vst [vmem:[#allocation2 + $0x98] sm:$0xff] %v2080_v27  ;;  %2101 = vrcp.f32 %v857_v39 }
  0xf3   : > { %v2084_v42 = vpop.eup %2083  ;;  %829 = vst [vmem:[#allocation2 + $0xa0] sm:$0xff] %v2082_v41  ;;  %2103 = vrcp.f32 %v858_v40 }
  0xf4   : > { %v2086_v43 = vpop.eup %2085  ;;  %830 = vst [vmem:[#allocation2 + $0xa8] sm:$0xff] %v2084_v42 }
  0xf5   : > { %v2088_v44 = vpop.eup %2087  ;;  %831 = vst [vmem:[#allocation2 + $0xb0] sm:$0xff] %v2086_v43 }
  0xf6   : > { %v2090_v45 = vpop.eup %2089  ;;  %832 = vst [vmem:[#allocation2 + $0xb8] sm:$0xff] %v2088_v44 }
  0xf7   : > { %v2092_v46 = vpop.eup %2091  ;;  %v859_v47 = vadd.f32 1.0, %v2090_v45 }
  0xf8   : > { %v2094_v48 = vpop.eup %2093  ;;  %v860_v49 = vadd.f32 1.0, %v2092_v46 }
  0xf9   : > { %v2096_v50 = vpop.eup %2095  ;;  %2105 = vrcp.f32 %v859_v47  ;;  %v898_v51 = vadd.f32 1.0, %v2094_v48 }
  0xfa   : > { %v2098_v52 = vpop.eup %2097  ;;  %2107 = vrcp.f32 %v860_v49  ;;  %v899_v53 = vadd.f32 1.0, %v2096_v50 }
  0xfb   : > { %v2100_v54 = vpop.eup %2099  ;;  %2109 = vrcp.f32 %v898_v51  ;;  %v900_v55 = vadd.f32 1.0, %v2098_v52 }
  0xfc   : > { %v2102_v56 = vpop.eup %2101  ;;  %2111 = vrcp.f32 %v899_v53  ;;  %v901_v57 = vadd.f32 1.0, %v2100_v54 }
  0xfd   : > { %v2104_v58 = vpop.eup %2103  ;;  %870 = vst [vmem:[#allocation2 + $0xc0] sm:$0xff] %v2102_v56  ;;  %2113 = vrcp.f32 %v900_v55 }
  0xfe   : > { %871 = vst [vmem:[#allocation2 + $0xc8] sm:$0xff] %v2104_v58  ;;  %2115 = vrcp.f32 %v901_v57 }
 0x103   : > { %v2106_v59 = vpop.eup %2105 }
 0x104   : > { %v2108_v60 = vpop.eup %2107  ;;  %872 = vst [vmem:[#allocation2 + $0xd0] sm:$0xff] %v2106_v59 }
 0x105   : > { %v2110_v61 = vpop.eup %2109  ;;  %873 = vst [vmem:[#allocation2 + $0xd8] sm:$0xff] %v2108_v60 }
 0x106   : > { %v2112_v62 = vpop.eup %2111  ;;  %911 = vst [vmem:[#allocation2 + $0xe0] sm:$0xff] %v2110_v61 }
 0x107   : > { %v2114_v63 = vpop.eup %2113  ;;  %912 = vst [vmem:[#allocation2 + $0xe8] sm:$0xff] %v2112_v62 }
 0x108   : > { %v2116_v0 = vpop.eup %2115  ;;  %913 = vst [vmem:[#allocation2 + $0xf0] sm:$0xff] %v2114_v63 }
 0x109   : > { %914 = vst [vmem:[#allocation2 + $0xf8] sm:$0xff] %v2116_v0 }
 0x10a PF: > { %s2776_s28 = sld [smem:[#allocation6]]  ;;  %v918_v1 = vld [vmem:[%s2653_s27] sm:$0xff]  ;;  %s2780_s14 = sshll.u32 %s2284_s16, 4  ;;  %v919_v3 = vld [vmem:[%s2653_s27 + $0x8] sm:$0xff]  ;;  %v930_v5 = vld [vmem:[#allocation2] sm:$0xff]  ;;  %v2318_v7 = vmov 0.0  }
 0x10b   : > { %s2783_s3 = sld [smem:[#allocation13 + %s2780_s14]]  ;;  %s935_s8 = sadd.s32 1, %s2780_s14  ;;  %v931_v6 = vld [vmem:[#allocation2 + $0x8] sm:$0xff]  ;;  %v938_v9 = vld [vmem:[#allocation2 + $0x20] sm:$0xff]  ;;  %v1085_v50 = vld [vmem:[#allocation2 + $0x10] sm:$0xff] }
 0x10c   : > { %s2786_s4 = sld [smem:[#allocation13 + %s935_s8]]  ;;  %s945_s29 = sadd.s32 2, %s2780_s14  ;;  %v939_v11 = vld [vmem:[#allocation2 + $0x28] sm:$0xff]  ;;  %v948_v13 = vld [vmem:[#allocation2 + $0x40] sm:$0xff]  ;;  %v1086_v51 = vld [vmem:[#allocation2 + $0x18] sm:$0xff] }
 0x10d   : > { %s2789_s23 = sld [smem:[#allocation13 + %s945_s29]]  ;;  %s955_s25 = sadd.s32 3, %s2780_s14  ;;  %v949_v22 = vld [vmem:[#allocation2 + $0x48] sm:$0xff]  ;;  %v958_v24 = vld [vmem:[#allocation2 + $0x60] sm:$0xff]  ;;  %v1093_v56 = vld [vmem:[#allocation2 + $0x30] sm:$0xff] }
 0x10e   : > { %v920_v2 = vld [vmem:[#allocation4] sm:$0xff]  ;;  %s2792_s9 = sld [smem:[#allocation13 + %s955_s25]]  ;;  %s965_s26 = sadd.s32 4, %s2780_s14  ;;  %v921_v4 = vld [vmem:[#allocation4 + $0x8] sm:$0xff]  ;;  %v1094_v57 = vld [vmem:[#allocation2 + $0x38] sm:$0xff] }
 0x10f   : > { %vm922_vm0 = vcmp.gt.f32.partialorder %v918_v1, %v920_v2  ;;  %s2796_s10 = sld [smem:[#allocation13 + %s965_s26]]  ;;  %s975_s11 = sadd.s32 5, %s2780_s14  ;;  %vm923_vm1 = vcmp.gt.f32.partialorder %v919_v3, %v921_v4  ;;  %v968_v21 = vld [vmem:[#allocation2 + $0x80] sm:$0xff]  ;;  %v959_v23 = vld [vmem:[#allocation2 + $0x68] sm:$0xff]  ;;  %v1103_v62 = vld [vmem:[#allocation2 + $0x50] sm:$0xff] }
 0x110   : > { %v2800_v8 = vsel %vm922_vm0, 1.0, %v2318_v7  ;;  %s2802_s8 = sld [smem:[#allocation13 + %s975_s11]]  ;;  %s985_s29 = sadd.s32 6, %s2780_s14  ;;  %v2806_v10 = vsel %vm923_vm1, 1.0, %v2318_v7  ;;  %v969_v34 = vld [vmem:[#allocation2 + $0x88] sm:$0xff]  ;;  %v978_v32 = vld [vmem:[#allocation2 + $0xa0] sm:$0xff]  ;;  %v2844_v49 = vstv %s2776_s28 }
 0x111   : > { %v932_v12 = vstv %s2783_s3  ;;  %s2809_s25 = sld [smem:[#allocation13 + %s985_s29]]  ;;  %s995_s26 = sadd.s32 7, %s2780_s14  ;;  %v1751_v14 = vpack.c.bf16 %v2806_v10, %v2800_v8  ;;  %v988_v33 = vld [vmem:[#allocation2 + $0xc0] sm:$0xff]  ;;  %v979_v39 = vld [vmem:[#allocation2 + $0xa8] sm:$0xff]  ;;  %v1104_v63 = vld [vmem:[#allocation2 + $0x58] sm:$0xff] }
 0x112   : > { %v933_v15 = vmul.f32 %v932_v12, %v930_v5  ;;  %v940_v16 = vstv %s2786_s4  ;;  %s2815_s11 = sld [smem:[#allocation13 + %s995_s26]]  ;;  %v934_v17 = vmul.f32 %v932_v12, %v931_v6  ;;  %s2818_s5 = sadd.s32 8, %s2780_s14  ;;  %v989_v27 = vld [vmem:[#allocation2 + $0xc8] sm:$0xff]  ;;  %v998_v42 = vld [vmem:[#allocation2 + $0xe0] sm:$0xff]  ;;  %v1113_v4 = vld [vmem:[#allocation2 + $0x70] sm:$0xff] }
 0x113   : > { %v941_v18 = vmul.f32 %v940_v16, %v938_v9  ;;  %v950_v19 = vstv %s2789_s23  ;;  %v942_v29 = vmul.f32 %v940_v16, %v939_v11  ;;  %1752 = vst [vmem:[%s2678_s2] sm:$0xff] %v1751_v14   ;;  %s2823_s3 = sld [smem:[#allocation13 + %s2818_s5]]  ;;  %s1090_s4 = sadd.s32 1, %s2818_s5  ;;  %v999_v45 = vld [vmem:[#allocation2 + $0xe8] sm:$0xff]  ;;  %v1114_v5 = vld [vmem:[#allocation2 + $0x78] sm:$0xff]  ;;  %v1123_v16 = vld [vmem:[#allocation2 + $0x90] sm:$0xff] }
 0x114   : > { %v951_v25 = vmul.f32 %v950_v19, %v948_v13  ;;  %v960_v26 = vstv %s2792_s9  ;;  %v952_v28 = vmul.f32 %v950_v19, %v949_v22  ;;  %s2827_s14 = sld [smem:[#allocation13 + %s1090_s4]]  ;;  %s1100_s29 = sadd.s32 2, %s2818_s5 }
 0x115   : > { %v943_v20 = vadd.f32 %v941_v18, %v933_v15  ;;  %v961_v30 = vmul.f32 %v960_v26, %v958_v24  ;;  %v970_v31 = vstv %s2796_s10  ;;  %v944_v35 = vadd.f32 %v942_v29, %v934_v17  ;;  %s2831_s23 = sld [smem:[#allocation13 + %s1100_s29]]  ;;  %s1110_s26 = sadd.s32 3, %s2818_s5  ;;  %v1124_v24 = vld [vmem:[#allocation2 + $0x98] sm:$0xff] }
 0x116   : > { %v971_v36 = vmul.f32 %v970_v31, %v968_v21  ;;  %v980_v37 = vstv %s2802_s8  ;;  %v962_v38 = vmul.f32 %v960_v26, %v959_v23  ;;  %s2835_s9 = sld [smem:[#allocation13 + %s1110_s26]]  ;;  %s1120_s4 = sadd.s32 4, %s2818_s5  ;;  %v972_v44 = vmul.f32 %v970_v31, %v969_v34  ;;  %v1133_v31 = vld [vmem:[#allocation2 + $0xb0] sm:$0xff] }
 0x117   : > { %v953_v40 = vadd.f32 %v951_v25, %v943_v20  ;;  %v990_v41 = vstv %s2809_s25  ;;  %v954_v43 = vadd.f32 %v952_v28, %v944_v35  ;;  %s2839_s10 = sld [smem:[#allocation13 + %s1120_s4]]  ;;  %s1130_s29 = sadd.s32 5, %s2818_s5  ;;  %v981_v46 = vmul.f32 %v980_v37, %v978_v32  ;;  %v1705_v32 = vld [vmem:[%s2653_s27 + $0x10] sm:$0xff] }
 0x118   : > { %v991_v47 = vmul.f32 %v990_v41, %v988_v33  ;;  %v1000_v48 = vstv %s2815_s11  ;;  %s2846_s8 = sld [smem:[#allocation13 + %s1130_s29]]  ;;  %s1140_s25 = sadd.s32 6, %s2818_s5  ;;  %v982_v54 = vmul.f32 %v980_v37, %v979_v39  ;;  %v992_v55 = vmul.f32 %v990_v41, %v989_v27  ;;  %v1072_v33 = vld [vmem:[#allocation4 + $0x10] sm:$0xff]  ;;  %v1134_v37 = vld [vmem:[#allocation2 + $0xb8] sm:$0xff]  ;;  %v1706_v41 = vld [vmem:[%s2653_s27 + $0x18] sm:$0xff] }
 0x119   : > { %v963_v52 = vadd.f32 %v961_v30, %v953_v40  ;;  %v964_v53 = vadd.f32 %v962_v38, %v954_v43  ;;  %s1150_s26 = sadd.s32 7, %s2818_s5  ;;  %v1001_v58 = vmul.f32 %v1000_v48, %v998_v42  ;;  %v1002_v59 = vmul.f32 %v1000_v48, %v999_v45  ;;  %s2852_s28 = sld [smem:[#allocation13 + %s1140_s25]]  ;;  %v1143_v27 = vld [vmem:[#allocation2 + $0xd0] sm:$0xff]  ;;  %v1073_v42 = vld [vmem:[#allocation4 + $0x18] sm:$0xff] }
 0x11a   : > { %v1087_v60 = vstv %s2823_s3  ;;  %v1095_v61 = vstv %s2827_s14  ;;  %s2856_s5 = sld [smem:[#allocation13 + %s1150_s26]]  ;;  %vm1074_vm2 = vcmp.gt.f32.partialorder %v1705_v32, %v1072_v33  ;;  %vm1075_vm3 = vcmp.gt.f32.partialorder %v1706_v41, %v1073_v42  ;;  %p1719_p3 = scmp.ne.s32.totalorder %s2284_s16, 1 }
 0x11b   : > { %v973_v0 = vadd.f32 %v971_v36, %v963_v52  ;;  %v974_v1 = vadd.f32 %v972_v44, %v964_v53  ;;  %v1088_v2 = vmul.f32 %v1087_v60, %v1085_v50  ;;  %v1089_v3 = vmul.f32 %v1087_v60, %v1086_v51  ;;  %v1153_v51 = vld [vmem:[#allocation2 + $0xf0] sm:$0xff]  ;;  %s3084_s14 = scalar_lea.vmem (!%p1719_p3), %s3020_s6, %s2670_s24 }
 0x11c   : > { %v1096_v6 = vmul.f32 %v1095_v61, %v1093_v56  ;;  %v1097_v9 = vmul.f32 %v1095_v61, %v1094_v57  ;;  %v1105_v11 = vstv %s2831_s23  ;;  %v1115_v12 = vstv %s2835_s9  ;;  %v1154_v56 = vld [vmem:[#allocation2 + $0xf8] sm:$0xff] }
 0x11d   : > { %v983_v13 = vadd.f32 %v981_v46, %v973_v0  ;;  %v984_v22 = vadd.f32 %v982_v54, %v974_v1  ;;  %v1106_v14 = vmul.f32 %v1105_v11, %v1103_v62  ;;  %v1107_v15 = vmul.f32 %v1105_v11, %v1104_v63  ;;  %v1144_v46 = vld [vmem:[#allocation2 + $0xd8] sm:$0xff] }
 0x11e   : > { %v1098_v17 = vadd.f32 %v1096_v6, %v1088_v2  ;;  %v1099_v18 = vadd.f32 %v1097_v9, %v1089_v3  ;;  %v1116_v19 = vmul.f32 %v1115_v12, %v1113_v4  ;;  %v1117_v21 = vmul.f32 %v1115_v12, %v1114_v5 }
 0x11f   : > { %v993_v29 = vadd.f32 %v991_v47, %v983_v13  ;;  %v994_v23 = vadd.f32 %v992_v55, %v984_v22  ;;  %v1125_v25 = vstv %s2839_s10  ;;  %v1135_v26 = vstv %s2846_s8 }
 0x120   : > { %v1108_v28 = vadd.f32 %v1106_v14, %v1098_v17  ;;  %v1109_v34 = vadd.f32 %v1107_v15, %v1099_v18  ;;  %v1126_v20 = vmul.f32 %v1125_v25, %v1123_v16  ;;  %v1127_v30 = vmul.f32 %v1125_v25, %v1124_v24 }
 0x121   : > { %v1003_v35 = vadd.f32 %v1001_v58, %v993_v29  ;;  %v1004_v36 = vadd.f32 %v1002_v59, %v994_v23  ;;  %v1145_v40 = vstv %s2852_s28  ;;  %v1136_v45 = vmul.f32 %v1135_v26, %v1133_v31 }
 0x122   : > { %v1118_v38 = vadd.f32 %v1116_v19, %v1108_v28  ;;  %v1119_v39 = vadd.f32 %v1117_v21, %v1109_v34  ;;  %v1137_v50 = vmul.f32 %v1135_v26, %v1134_v37  ;;  %v1155_v52 = vstv %s2856_s5 }
 0x123   : > { %v2864_v43 = vadd.f32 %v2844_v49, %v1003_v35  ;;  %v2867_v44 = vadd.f32 %v2844_v49, %v1004_v36  ;;  %v1146_v55 = vmul.f32 %v1145_v40, %v1143_v27  ;;  %v1147_v57 = vmul.f32 %v1145_v40, %v1144_v46 }
 0x124   : > { %v1128_v47 = vadd.f32 %v1126_v20, %v1118_v38  ;;  %v1129_v48 = vadd.f32 %v1127_v30, %v1119_v39  ;;  %v1156_v61 = vmul.f32 %v1155_v52, %v1153_v51  ;;  %v1157_v63 = vmul.f32 %v1155_v52, %v1154_v56  ;;  %v1058_v56 = vld [vmem:[#allocation5] sm:$0xff] }
 0x125   : > { %v1008_v53 = vand.u32 2147483647, %v2864_v43  ;;  %v1009_v54 = vand.u32 2147483647, %v2867_v44  ;;  %v1707_v0 = vsel %vm1074_vm2, 1.0, %v2318_v7  ;;  %v2875_v1 = vsel %vm1075_vm3, 1.0, %v2318_v7 }
 0x126   : > { %v1138_v60 = vadd.f32 %v1136_v45, %v1128_v47  ;;  %v1139_v62 = vadd.f32 %v1137_v50, %v1129_v48  ;;  %v1759_v5 = vpack.c.bf16 %v2875_v1, %v1707_v0  ;;  %v1026_v23 = vmax.f32 %v2864_v43, 0.0  ;;  %v1060_v45 = vld [vmem:[#allocation3] sm:$0xff]  ;;  %v1061_v48 = vld [vmem:[#allocation3 + $0x8] sm:$0xff] }
 0x127   : > { %v1010_v58 = vsub.f32 0.0, %v1008_v53  ;;  %v1011_v59 = vsub.f32 0.0, %v1009_v54  ;;  %v1028_v25 = vmul.f32 %v2800_v8, %v2864_v43  ;;  %v1027_v20 = vmax.f32 %v2867_v44, 0.0 }
 0x128   : > { %v1148_v4 = vadd.f32 %v1146_v55, %v1138_v60  ;;  %v1149_v6 = vadd.f32 %v1147_v57, %v1139_v62  ;;  %1763 = vst [vmem:[%s2678_s2 + $0x8] sm:$0xff] %v1759_v5   ;;  %v1029_v30 = vmul.f32 %v2806_v10, %v2867_v44  ;;  %vm1020_vm4 = vcmp.ge.f32.partialorder %v2864_v43, 0.0 }
 0x129   : > { %v1012_v2 = vmul.f32 1.442695, %v1010_v58  ;;  %v1014_v3 = vmul.f32 1.442695, %v1011_v59  ;;  %v1030_v35 = vsub.f32 %v1026_v23, %v1028_v25  ;;  %vm1021_vm5 = vcmp.ge.f32.partialorder %v2867_v44, 0.0 }
 0x12a   : > { %v1158_v9 = vadd.f32 %v1156_v61, %v1148_v4  ;;  %v1159_v11 = vadd.f32 %v1157_v63, %v1149_v6  ;;  %v1031_v39 = vsub.f32 %v1027_v20, %v1029_v30  ;;  %v1059_v61 = vld [vmem:[#allocation5 + $0x8] sm:$0xff]  ;;  %v1218_v6 = vld [vmem:[#allocation3 + $0x18] sm:$0xff]  ;;  %vm1242_vm8 = vcmask (!%p1719_p3), 0  }
 0x12b   : > { %2117 = vpow2.f32 %v1012_v2  ;;  %v1217_v2 = vld [vmem:[#allocation3 + $0x10] sm:$0xff] }
 0x12c   : > { %2119 = vpow2.f32 %v1014_v3  ;;  %v2880_v12 = vadd.f32 %v1158_v9, %v2844_v49  ;;  %v2883_v13 = vadd.f32 %v1159_v11, %v2844_v49 }
 0x12e   : > { %v1162_v7 = vand.u32 2147483647, %v2880_v12  ;;  %v1163_v22 = vand.u32 2147483647, %v2883_v13  ;;  %v1180_v42 = vmax.f32 %v2880_v12, 0.0  ;;  %v1182_v43 = vmul.f32 %v1707_v0, %v2880_v12 }
 0x12f   : > { %v1181_v44 = vmax.f32 %v2883_v13, 0.0  ;;  %v1183_v47 = vmul.f32 %v2875_v1, %v2883_v13  ;;  %vm1174_vm6 = vcmp.ge.f32.partialorder %v2880_v12, 0.0  ;;  %vm1175_vm7 = vcmp.ge.f32.partialorder %v2883_v13, 0.0 }
 0x130   : > { %v1164_v14 = vsub.f32 0.0, %v1162_v7  ;;  %v1165_v15 = vsub.f32 0.0, %v1163_v22  ;;  %v1184_v54 = vsub.f32 %v1180_v42, %v1182_v43 }
 0x131   : > { %v1185_v59 = vsub.f32 %v1181_v44, %v1183_v47 }
 0x132   : > { %v1166_v16 = vmul.f32 1.442695, %v1164_v14  ;;  %v1168_v24 = vmul.f32 1.442695, %v1165_v15 }
 0x134   : > { %2121 = vpow2.f32 %v1166_v16 }
 0x135   : > { %v2118_v17 = vpop.eup %2117  ;;  %2123 = vpow2.f32 %v1168_v24 }
 0x136   : > { %v2120_v18 = vpop.eup %2119  ;;  %v1016_v19 = vadd.f32 1.0, %v2118_v17 }
 0x137   : > { %v1017_v21 = vadd.f32 1.0, %v2120_v18 }
 0x138   : > { %2125 = vrcp.f32 %v1016_v19 }
 0x139   : > { %2127 = vlog2.f32 %v1016_v19 }
 0x13a   : > { %2129 = vrcp.f32 %v1017_v21 }
 0x13b   : > { %2131 = vlog2.f32 %v1017_v21 }
 0x13e   : > { %v2122_v49 = vpop.eup %2121 }
 0x13f   : > { %v2124_v29 = vpop.eup %2123  ;;  %v1170_v26 = vadd.f32 1.0, %v2122_v49 }
 0x140   : > { %v1171_v28 = vadd.f32 1.0, %v2124_v29 }
 0x141   : > { %2133 = vrcp.f32 %v1170_v26 }
 0x142   : > { %v2126_v34 = vpop.eup %2125  ;;  %2135 = vrcp.f32 %v1171_v28 }
 0x143   : > { %v2128_v31 = vpop.eup %2127  ;;  %v1022_v32 = vsub.f32 1.0, %v2126_v34  ;;  %2137 = vlog2.f32 %v1170_v26 }
 0x144   : > { %v2130_v33 = vpop.eup %2129  ;;  %v1033_v36 = vmul.f32 0.6931472, %v2128_v31  ;;  %2139 = vlog2.f32 %v1171_v28 }
 0x145   : > { %v2132_v8 = vpop.eup %2131  ;;  %v1023_v37 = vsub.f32 1.0, %v2130_v33  ;;  %v1024_v38 = vsel %vm1020_vm4, %v2126_v34, %v1022_v32 }
 0x146   : > { %v1035_v27 = vmul.f32 0.6931472, %v2132_v8  ;;  %v1036_v41 = vadd.f32 %v1033_v36, %v1030_v35 }
 0x147   : > { %v1025_v10 = vsel %vm1021_vm5, %v2130_v33, %v1023_v37 }
 0x148   : > { %v1748_v40 = vpack.c.bf16 %v1025_v10, %v1024_v38  ;;  %v1037_v46 = vadd.f32 %v1035_v27, %v1031_v39  ;;  %v1062_v52 = vmul.f32 %v1060_v45, %v1036_v41 }
 0x14a   : > { %1749 = vst [vmem:[%s2676_s20] sm:$0xff] %v1748_v40   ;;  %v1063_v57 = vmul.f32 %v1061_v48, %v1037_v46  ;;  %v1064_v3 = vadd.f32 %v1062_v52, %v1058_v56 }
 0x14b   : > { %v2134_v50 = vpop.eup %2133 }
 0x14c   : > { %v2136_v51 = vpop.eup %2135  ;;  %v1176_v53 = vsub.f32 1.0, %v2134_v50  ;;  %v1065_v9 = vadd.f32 %v1063_v57, %v1059_v61 }
 0x14d   : > { %v2138_v55 = vpop.eup %2137  ;;  %v1177_v58 = vsub.f32 1.0, %v2136_v51 }
 0x14e   : > { %v2140_v60 = vpop.eup %2139  ;;  %v1178_v62 = vsel %vm1174_vm6, %v2134_v50, %v1176_v53  ;;  %v1187_v63 = vmul.f32 0.6931472, %v2138_v55 }
 0x14f   : > { %v1179_v0 = vsel %vm1175_vm7, %v2136_v51, %v1177_v58  ;;  %v1189_v1 = vmul.f32 0.6931472, %v2140_v60 }
 0x150   : > { %v1756_v4 = vpack.c.bf16 %v1179_v0, %v1178_v62  ;;  %v1190_v5 = vadd.f32 %v1187_v63, %v1184_v54 }
 0x151   : > { %v1191_v11 = vadd.f32 %v1189_v1, %v1185_v59  ;;  %1228 = sbr.rel (%p1719_p3) target bundleno = 559 (0x22f), region = 72 }
 0x152   : > { %1762 = vst [vmem:[%s2676_s20 + $0x8] sm:$0xff] %v1756_v4   ;;  %v1219_v12 = vmul.f32 %v1217_v2, %v1190_v5 }
 0x153   : > { %v1220_v13 = vmul.f32 %v1218_v6, %v1191_v11 }
 0x154   : > { %v1221_v7 = vadd.f32 %v1219_v12, %v1064_v3 }
 0x155   : > { %v1222_v22 = vadd.f32 %v1220_v13, %v1065_v9 }
 0x156   : > { %1223 = vst [vmem:[#allocation5] sm:$0xff] %v1221_v7 }
 0x157   : > { %1224 = vst [vmem:[#allocation5 + $0x8] sm:$0xff] %v1222_v22 }
 0x15d   : > { %v1229_v14 = vld [vmem:[#allocation5] sm:$0xff] }
 0x15e   : > { %v1230_v15 = vld [vmem:[#allocation5 + $0x8] sm:$0xff] }
 0x15f   : > { %v1231_v16 = vadd.f32 %v1230_v15, %v1229_v14 }
 0x161   : > { %1232 = vadd.xlane.f32.xlu0 %v1231_v16 }
 0x1ee   : > { %v1233_v24 = vpop.xlane.xlu0 %1232 }
 0x1ef   : > { %v1234_v17 = vrot.slane %v1233_v24, 4 }
 0x1f1   : > { %v1235_v18 = vadd.f32 %v1234_v17, %v1233_v24 }
 0x1f3   : > { %v1236_v19 = vrot.slane %v1235_v18, 2 }
 0x1f5   : > { %v1237_v21 = vadd.f32 %v1236_v19, %v1235_v18 }
 0x1f7   : > { %v1238_v49 = vrot.slane %v1237_v21, 1 }
 0x1f9   : > { %v1239_v29 = vadd.f32 %v1238_v49, %v1237_v21 }
 0x1fb   : > { %1764 = vpush %v1239_v29 }
 0x22c   : > { %s1765_s27 = spop %1764 }
 0x22d   : > { %v1241_v23 = vstv %s1765_s27 }
 0x22e   : > { %1243 = vst.msk [vmem:[%s3084_s14] sm:$0x1] %vm1242_vm8, %v1241_v23 }
 0x22f PF: > { %s1252_s23 = sand.u32 1, %s2449_s21   ;;  %s1248_s9 = scalar_lea.sflag [#allocation9], %s2649_s22 }
 0x230   : > { %s2912_s4 = scalar_lea.sflag [#allocation19], %s1252_s23 }
 0x231   : > { %s1723_s10 = sshll.u32 %s2288_s17, 1  ;;  %s1724_s29 = sshll.u32 %s2284_s16, 3 }
 0x232   : > { %s1273_s24 = sadd.s32 %s1724_s29, %s1723_s10  ;;  %s1292_s8 = sshll.u32 %s2676_s20, 4  ;;  %s1293_s8 = int_to_ptr.vmem [resolvable:$true] %s1292_s8 }
 0x233   : > { %s1725_s25 = sshll.u32 %s1273_s24, 6  ;;  %s3085_s26 = sld [smem:[#allocation53_spill]] }
 0x234   : > { %s2319_s5 = smov 128   ;;  %p3086_p12 = scmp.ne.s32.totalorder %s3061_s30, 0 }
 0x235   : > { %s2320_s27 = smov 256   ;;  %s2321_s11 = smov 2  }
 0x236   : > { %1796 = sst [smem:[#allocation26]] (%p3086_p12), %s2319_s5  ;;  %s2322_s16 = smov 64  }
 0x237   : > { %1797 = sst [smem:[#allocation26 + $0x1]] (%p3086_p12), %s2320_s27  ;;  %s2323_s20 = smov 4  }
 0x238   : > { %1798 = sst [smem:[#allocation26 + $0x2]] (%p3086_p12), %s2321_s11  ;;  %s2324_s3 = smov [#allocation25]  }
 0x239   : > { %s1275_s28 = scalar_lea.hbm %s3085_s26, %s1725_s25  ;;  %1799 = sst [smem:[#allocation26 + $0x3]] (%p3086_p12), %s2322_s16 }
 0x23a   : > { %1800 = sst [smem:[#allocation26 + $0x4]] (%p3086_p12), %s2322_s16  ;;  %s2325_s14 = smov 0  }
 0x23b   : > { %1801 = sst [smem:[#allocation26 + $0x5]] (%p3086_p12), %s2323_s20 }
 0x23c   : > { %1802 = dma.general (%p3086_p12), %s1293_s8, 256, %s1275_s28, %s1248_s9, %s2324_s3, [#allocation26], %s2325_s14, 0  }
 0x23d   : > { %s3087_s29 = sld [smem:[#allocation54_spill]]  ;;  %s1339_s21 = sshll.u32 %s2678_s2, 4  ;;  %s1340_s21 = int_to_ptr.vmem [resolvable:$true] %s1339_s21 }
 0x23e   : > { %s2326_s22 = smov 128   ;;  %s2327_s26 = smov 256  }
 0x23f   : > { %1803 = sst [smem:[#allocation28]] (%p3086_p12), %s2326_s22  ;;  %s2328_s9 = smov 2  }
 0x240   : > { %1804 = sst [smem:[#allocation28 + $0x1]] (%p3086_p12), %s2327_s26  ;;  %s2329_s8 = smov 64  }
 0x241   : > { %1805 = sst [smem:[#allocation28 + $0x2]] (%p3086_p12), %s2328_s9  ;;  %s2330_s28 = smov 4  }
 0x242   : > { %1806 = sst [smem:[#allocation28 + $0x3]] (%p3086_p12), %s2329_s8  ;;  %s2332_s2 = smov 0  }
 0x243   : > { %s1322_s24 = scalar_lea.hbm %s3087_s29, %s1725_s25  ;;  %1807 = sst [smem:[#allocation28 + $0x4]] (%p3086_p12), %s2329_s8 }
 0x244   : > { %1808 = sst [smem:[#allocation28 + $0x5]] (%p3086_p12), %s2330_s28  ;;  %s2331_s25 = smov [#allocation27]  }
 0x245   : > { %1809 = dma.general (%p3086_p12), %s1340_s21, 256, %s1322_s24, %s2912_s4, %s2331_s25, [#allocation28], %s2332_s2, 0  }
 0x246   : > { %s3088_s5 = sld [smem:[#allocation47_spill]]  ;;  %s1744_s27 = sshll.u32 %s2288_s17, 8 }
 0x247   : > { %s1384_s11 = sshll.u32 %s2680_s7, 4  ;;  %s3089_s3 = sld [smem:[#allocation55_spill]]  ;;  %s1385_s11 = int_to_ptr.vmem [resolvable:$true] %s1384_s11 }
 0x248   : > { %s2333_s23 = smov 256   ;;  %s2334_s30 = smov 512  }
 0x249   : > { %s2335_s10 = smov 2   ;;  %s2336_s29 = smov 128  }
 0x24a   : > { %s2337_s17 = smov 8   ;;  %s2338_s7 = smov [#allocation29]  }
 0x24b   : > { %s2339_s24 = smov 0  }
 0x24c   : > { %p3090_p8 = scmp.ne.s32.totalorder %s3088_s5, 0 }
 0x24d   : > { %s1367_s14 = scalar_lea.hbm %s3089_s3, %s1744_s27 }
 0x24e   : > { %1810 = sst [smem:[#allocation30]] (%p3090_p8), %s2333_s23 }
 0x24f   : > { %1811 = sst [smem:[#allocation30 + $0x1]] (%p3090_p8), %s2334_s30 }
 0x250   : > { %1812 = sst [smem:[#allocation30 + $0x2]] (%p3090_p8), %s2335_s10 }
 0x251   : > { %1813 = sst [smem:[#allocation30 + $0x3]] (%p3090_p8), %s2336_s29 }
 0x252   : > { %1814 = sst [smem:[#allocation30 + $0x4]] (%p3090_p8), %s2336_s29 }
 0x253   : > { %1815 = sst [smem:[#allocation30 + $0x5]] (%p3090_p8), %s2337_s17 }
 0x254   : > { %1816 = dma.general (%p3090_p8), %s1385_s11, 512, %s1367_s14, %s2912_s4, %s2338_s7, [#allocation30], %s2339_s24, 0  }
 0x255 PF: > { %s3091_s21 = sld [smem:[#allocation42_spill]]  ;;  %s3092_s22 = sld [smem:[#allocation40_spill]] }
 0x256   : > { %s3093_s26 = sld [smem:[#allocation48_spill]] }
 0x25b   : > { %p1846_p7 = scmp.ge.s32.totalorder %s3091_s21, 2  ;;  %s1418_s9 = sand.u32 1, %s3092_s22  }
 0x25c   : > { %p3094_p9 = scmp.ne.s32.totalorder %s3093_s26, 0  ;;  %s1419_s8 = scalar_lea.sflag [#allocation9], %s1418_s9 }
 0x25e   : > { %p1831_p1 = pnand %p1846_p7, %p3094_p9 }
 0x260   : > { %2247 = dma.done.wait (!%p1831_p1), %s1419_s8, 256  }
 0x261   : > { %2249 = vsyncadd (!%p1831_p1), %s1419_s8, 4294967040  ;;  %s3095_s28 = sadd.s32 4294967294, %s3091_s21  }
 0x262   : > { %s1427_s25 = sand.u32 1, %s3095_s28  }
 0x263   : > { %s1428_s2 = scalar_lea.sflag [#allocation19], %s1427_s25 }
 0x264   : > { %2251 = dma.done.wait (!%p1831_p1), %s1428_s2, 256  }
 0x265   : > { %2253 = vsyncadd (!%p1831_p1), %s1428_s2, 4294967040  ;;  %s3096_s27 = sld [smem:[#allocation49_spill]] }
 0x26b   : > { %p3097_p6 = scmp.ne.s32.totalorder %s3096_s27, 0 }
 0x26d   : > { %p1837_p4 = pnand %p1846_p7, %p3097_p6 }
 0x26f   : > { %2255 = dma.done.wait (!%p1837_p4), %s1428_s2, 512  }
 0x270   : > { %2257 = vsyncadd (!%p1837_p4), %s1428_s2, 4294966784  ;;  %s35_s20 = sadd.s32 1, %s3091_s21   ;;  %s3098_s4 = sld [smem:[#allocation46_spill]] }
 0x271   : > { %p32_p0 = scmp.ge.s32.totalorder %s35_s20, 6   ;;  %s3099_s5 = sld [smem:[#allocation41_spill]] }
 0x272   : > { %s3100_s16 = sld [smem:[#allocation45_spill]]  ;;  %s3101_s3 = sld [smem:[#allocation43_spill]] }
 0x273   : > { %s3102_s23 = sld [smem:[#allocation44_spill]]  ;;  %s3103_s11 = smov %s2264_s12 }
 0x274   : > { %s3104_s12 = smov %s2268_s13  ;;  %s3106_s14 = smov %s2276_s15 }
 0x275   : > { %s3110_s17 = smov %s2296_s19  ;;  %34 = sbr.rel (!%p32_p0) target bundleno = 23 (0x17), region = 219 }
 0x276   : > { %s3105_s13 = smov %s3098_s4 }
 0x277   : > { %s3107_s15 = smov %s3099_s5 }
 0x278   : > { %s3108_s5 = smov %s3100_s16  ;;  %s3109_s16 = smov %s2292_s18 }
 0x279   : > { %s3111_s18 = smov %s3101_s3  ;;  %s3112_s19 = smov %s3102_s23 }
 0x27c   :  { %1442 = vsyncpa [#allocation8], 1 }
 0x27d   :  { %1444 = vsyncpa [#allocation8 + $0x1], 1 }
 0x27e   :  { %1445 = vsyncpa [#allocation12], 1 }
 0x27f   :  { %1447 = vsyncpa [#allocation12 + $0x1], 1 }
 0x280   :  { %1448 = vsyncpa [#allocation9], 1 }
 0x281   :  { %1450 = vsyncpa [#allocation9 + $0x1], 1 }
 0x282   :  { %1451 = vsyncpa [#allocation19], 1 }
 0x283   :  { %1453 = vsyncpa [#allocation19 + $0x1], 1 }
 0x284   :  { %1454 = vsyncpa [#allocation10], 1 }
 0x285   :  { %1456 = vsyncpa [#allocation10 + $0x1], 1 }
 0x286   :  { %1457 = vsyncpa [#allocation15], 1 }

</bundles_post_ra>
